<compile_context>
chip_gen: v7x
topology: tpu7x:2x2x1
jax: 0.10.0
libtpu: 0.0.40
codegen_flags: <defaults>
</compile_context>

<pallas_src>
import functools
import math

import jax
import jax.numpy as jnp
import numpy as np
from jax.experimental import pallas as pl
from jax.experimental.pallas import tpu as pltpu


# ----------------------------------------------------------------------------
# Pallas kernel: one full decoder block for a single batch element.
# ----------------------------------------------------------------------------
def _decoder_block_kernel(
    x_ref, enc_ref, mask_ref,
    wqkv1_ref, wo1_ref, bo1_ref,
    wq2_ref, wkv2_ref, wo2_ref, bo2_ref,
    g1_ref, be1_ref, g2_ref, be2_ref, g3_ref, be3_ref,
    wf1_ref, bf1_ref, wf2_ref, bf2_ref,
    out_ref,
    *, n_heads: int, head_dim: int,
):
    H, dh = n_heads, head_dim
    scale = 1.0 / math.sqrt(dh)

    x = x_ref[0]        # (S, D)
    enc = enc_ref[0]    # (Se, D)

    # Additive attention bias from the {0,1} mask, computed ONCE (hoisted out of
    # the attention); -1e30 instead of -inf avoids NaN for fully-masked rows.
    mask_bias = jnp.where(mask_ref[...] == 0.0, -1e30, 0.0).astype(jnp.float32)

    def layernorm(v, g, b):
        mu = jnp.mean(v, axis=-1, keepdims=True)
        var = jnp.mean((v - mu) ** 2, axis=-1, keepdims=True)   # biased, like torch
        return (v - mu) * jax.lax.rsqrt(var + 1e-5) * g + b

    def heads_leading(mat, n_groups):
        # (S, n_groups*H*dh) -> (n_groups*H, S, dh) using only a 2-D transpose,
        # a leading-dim split and a batched minor-dim swap (cheap relayouts).
        s = mat.shape[0]
        return mat.T.reshape(n_groups * H, dh, s).transpose(0, 2, 1)

    def attention(Qh, Kh, Vh, bias, wo3, bo):
        # Qh: (H, Sq, dh); Kh, Vh: (H, Sk, dh); wo3: (H, dh, D).
        # Leading-batch contraction on the last dims -> no materialized K^T.
        s = jnp.einsum('hqd,hkd->hqk', Qh * scale, Kh,
                       preferred_element_type=jnp.float32)        # (H, Sq, Sk)
        if bias is not None:
            s = s + bias[None, :, :]
        m = jnp.max(s, axis=-1, keepdims=True)
        p = jnp.exp(s - m)
        denom = jnp.sum(p, axis=-1, keepdims=True)                # (H, Sq, 1)
        o = jnp.einsum('hqk,hkd->hqd', p, Vh,
                       preferred_element_type=jnp.float32)        # (H, Sq, dh)
        # Normalize AFTER P@V (touches Sq*dh, not Sq*Sk); reciprocal -> EUP.
        o = o * pl.reciprocal(denom, approx=True)
        # Output projection folded per-head: replaces concat + 2-D matmul.
        out = jnp.einsum('hqd,hdn->hqn', o, wo3,
                         preferred_element_type=jnp.float32)      # (H, Sq, D)
        return jnp.sum(out, axis=0) + bo                          # (Sq, D)

    # ---- norm_first=True forward path --------------------------------------
    # Self-attention: single fused QKV projection (one MXU call, 96-lane output).
    x1 = layernorm(x, g1_ref[...], be1_ref[...])
    qkv = heads_leading(
        jnp.dot(x1, wqkv1_ref[...], preferred_element_type=jnp.float32), 3)
    x2 = x1 + attention(qkv[:H], qkv[H:2 * H], qkv[2 * H:], mask_bias,
                        wo1_ref[...], bo1_ref[...])

    # Cross-attention: fused K/V projection on the encoder outputs.
    x3 = layernorm(x2, g2_ref[...], be2_ref[...])
    q2 = heads_leading(
        jnp.dot(x3, wq2_ref[...], preferred_element_type=jnp.float32), 1)
    kv = heads_leading(
        jnp.dot(enc, wkv2_ref[...], preferred_element_type=jnp.float32), 2)
    x4 = x3 + attention(q2, kv[:H], kv[H:], None,
                        wo2_ref[...], bo2_ref[...])

    # Feed-forward.
    h = layernorm(x4, g3_ref[...], be3_ref[...])
    h = jnp.maximum(jnp.dot(h, wf1_ref[...],
                            preferred_element_type=jnp.float32) + bf1_ref[...], 0.0)
    h = jnp.dot(h, wf2_ref[...], preferred_element_type=jnp.float32) + bf2_ref[...]
    # nn.Dropout layers are identity here (inference semantics).
    out_ref[0] = x4 + h


# ----------------------------------------------------------------------------
# Wrapper
# ----------------------------------------------------------------------------
def transformer_decoder_block(x, enc, mask, params, *, n_heads):
    B, S, D = x.shape
    Se = enc.shape[1]
    n_hidden = params["wq1"].shape[1]
    head_dim = n_hidden // n_heads

    # Fuse projection weights (one matmul instead of 3 / 2) and pre-shape the
    # output projections per head so the kernel needs no concat.
    wqkv1 = jnp.concatenate([params["wq1"], params["wk1"], params["wv1"]], axis=1)
    wkv2 = jnp.concatenate([params["wk2"], params["wv2"]], axis=1)
    wo1_h = params["wo1"].reshape(n_heads, head_dim, -1)
    wo2_h = params["wo2"].reshape(n_heads, head_dim, -1)

    ordered = [
        wqkv1, wo1_h, params["bo1"],
        params["wq2"], wkv2, wo2_h, params["bo2"],
        params["g1"], params["be1"], params["g2"], params["be2"],
        params["g3"], params["be3"],
        params["wf1"], params["bf1"], params["wf2"], params["bf2"],
    ]

    def full_block(a):
        # whole (small) parameter array as one block, same for every grid step
        return pl.BlockSpec(a.shape, lambda b: (0,) * a.ndim)

    in_specs = (
        [pl.BlockSpec((1, S, D), lambda b: (b, 0, 0)),     # x
         pl.BlockSpec((1, Se, D), lambda b: (b, 0, 0)),    # enc_outputs
         pl.BlockSpec((S, S), lambda b: (0, 0))]           # mask (shared)
        + [full_block(a) for a in ordered]
    )

    kernel = functools.partial(_decoder_block_kernel,
                               n_heads=n_heads, head_dim=head_dim)

    return pl.pallas_call(
        kernel,
        out_shape=jax.ShapeDtypeStruct((B, S, D), jnp.float32),
        grid=(B,),
        in_specs=in_specs,
        out_specs=pl.BlockSpec((1, S, D), lambda b: (b, 0, 0)),
        compiler_params=pltpu.CompilerParams(
            dimension_semantics=("parallel",)),
    )(x, enc, mask, *ordered)


# ----------------------------------------------------------------------------
# Pure-JAX reference (mirrors the PyTorch forward exactly) for validation.
# ----------------------------------------------------------------------------
def _reference(x, enc, mask, p, n_heads):
    def ln(v, g, b):
        mu = v.mean(-1, keepdims=True)
        var = ((v - mu) ** 2).mean(-1, keepdims=True)
        return (v - mu) / jnp.sqrt(var + 1e-5) * g + b

    def mha(q_in, kv_in, wq, wk, wv, wo, bo, msk):
        B, Sq, _ = q_in.shape
        Sk = kv_in.shape[1]
        Q = q_in @ wq
        K = kv_in @ wk
        V = kv_in @ wv
        dh = Q.shape[-1] // n_heads
        Q = Q.reshape(B, Sq, n_heads, dh).transpose(0, 2, 1, 3)
        K = K.reshape(B, Sk, n_heads, dh).transpose(0, 2, 1, 3)
        V = V.reshape(B, Sk, n_heads, dh).transpose(0, 2, 1, 3)
        s = Q @ K.transpose(0, 1, 3, 2) / math.sqrt(dh)
        if msk is not None:
            s = jnp.where(msk == 0, -jnp.inf, s)
        a = jax.nn.softmax(s, axis=-1)
        o = (a @ V).transpose(0, 2, 1, 3).reshape(B, Sq, n_heads * dh)
        return o @ wo + bo

    x1 = ln(x, p["g1"], p["be1"])
    x2 = x1 + mha(x1, x1, p["wq1"], p["wk1"], p["wv1"], p["wo1"], p["bo1"], mask)
    x3 = ln(x2, p["g2"], p["be2"])
    x4 = x3 + mha(x3, enc, p["wq2"], p["wk2"], p["wv2"], p["wo2"], p["bo2"], None)
    h = ln(x4, p["g3"], p["be3"])
    h = jnp.maximum(h @ p["wf1"] + p["bf1"], 0.0) @ p["wf2"] + p["bf2"]
    return x4 + h


# ----------------------------------------------------------------------------
if __name__ == "__main__":
    # Small, module-consistent shapes.
    B, S, Se = 2, 8, 8
    n_heads, n_hidden, n_out, ffn_hidden = 4, 32, 32, 64

    key = jax.random.PRNGKey(0)
    ks = jax.random.split(key, 20)

    def rnd(k, shape, scale=0.05):
        return (scale * jax.random.normal(k, shape)).astype(jnp.float32)

    params = {
        # self-attention MHA
        "wq1": rnd(ks[0], (n_out, n_hidden)),
        "wk1": rnd(ks[1], (n_out, n_hidden)),
        "wv1": rnd(ks[2], (n_out, n_hidden)),
        "wo1": rnd(ks[3], (n_hidden, n_out)),
        "bo1": rnd(ks[4], (1, n_out)),
        # cross-attention MHA
        "wq2": rnd(ks[5], (n_out, n_hidden)),
        "wk2": rnd(ks[6], (n_out, n_hidden)),
        "wv2": rnd(ks[7], (n_out, n_hidden)),
        "wo2": rnd(ks[8], (n_hidden, n_out)),
        "bo2": rnd(ks[9], (1, n_out)),
        # layer norms (gamma ~ 1, beta small)
        "g1": (1.0 + rnd(ks[10], (1, n_out))), "be1": rnd(ks[11], (1, n_out)),
        "g2": (1.0 + rnd(ks[12], (1, n_out))), "be2": rnd(ks[13], (1, n_out)),
        "g3": (1.0 + rnd(ks[14], (1, n_out))), "be3": rnd(ks[15], (1, n_out)),
        # feed-forward
        "wf1": rnd(ks[16], (n_out, ffn_hidden)), "bf1": rnd(ks[17], (1, ffn_hidden)),
        "wf2": rnd(ks[18], (ffn_hidden, n_out)), "bf2": rnd(ks[19], (1, n_out)),
    }

    kx, ke = jax.random.split(jax.random.PRNGKey(1))
    x = jax.random.normal(kx, (B, S, n_out), dtype=jnp.float32)
    enc = jax.random.normal(ke, (B, Se, n_out), dtype=jnp.float32)
    mask = jnp.tril(jnp.ones((S, S), dtype=jnp.float32))  # causal self-attn mask

    out = transformer_decoder_block(x, enc, mask, params, n_heads=n_heads)
    out = jax.block_until_ready(out)

    ref = _reference(x, enc, mask, params, n_heads)
    # Tolerance covers the approximate (EUP) reciprocal in the softmax path.
    np.testing.assert_allclose(np.asarray(out), np.asarray(ref),
                               rtol=1e-3, atol=1e-3)
    print("KERNEL_OK")
</pallas_src>

<mosaic_0001>
module attributes {stable_mosaic.version = 11 : i64} {
  func.func @_decoder_block_kernel(%arg0: i32, %arg1: memref<1x8x32xf32, #tpu.memory_space<vmem>>, %arg2: memref<1x8x32xf32, #tpu.memory_space<vmem>>, %arg3: memref<8x8xf32, #tpu.memory_space<vmem>>, %arg4: memref<32x96xf32, #tpu.memory_space<vmem>>, %arg5: memref<4x8x32xf32, #tpu.memory_space<vmem>>, %arg6: memref<1x32xf32, #tpu.memory_space<vmem>>, %arg7: memref<32x32xf32, #tpu.memory_space<vmem>>, %arg8: memref<32x64xf32, #tpu.memory_space<vmem>>, %arg9: memref<4x8x32xf32, #tpu.memory_space<vmem>>, %arg10: memref<1x32xf32, #tpu.memory_space<vmem>>, %arg11: memref<1x32xf32, #tpu.memory_space<vmem>>, %arg12: memref<1x32xf32, #tpu.memory_space<vmem>>, %arg13: memref<1x32xf32, #tpu.memory_space<vmem>>, %arg14: memref<1x32xf32, #tpu.memory_space<vmem>>, %arg15: memref<1x32xf32, #tpu.memory_space<vmem>>, %arg16: memref<1x32xf32, #tpu.memory_space<vmem>>, %arg17: memref<32x64xf32, #tpu.memory_space<vmem>>, %arg18: memref<1x64xf32, #tpu.memory_space<vmem>>, %arg19: memref<64x32xf32, #tpu.memory_space<vmem>>, %arg20: memref<1x32xf32, #tpu.memory_space<vmem>>, %arg21: memref<1x8x32xf32, #tpu.memory_space<vmem>>) attributes {dimension_semantics = [#tpu.dimension_semantics<parallel>], iteration_bounds = array<i64: 2>, scalar_prefetch = 0 : i64, scratch_operands = 0 : i64, tpu.core_type = #tpu.core_type<tc>, window_params = [{transform_indices = @transform_0, window_bounds = array<i64: 1, 8, 32>}, {transform_indices = @transform_1, window_bounds = array<i64: 1, 8, 32>}, {pipeline_mode = #tpu.pipeline_mode<synchronous>, transform_indices = @transform_2, window_bounds = array<i64: 8, 8>}, {pipeline_mode = #tpu.pipeline_mode<synchronous>, transform_indices = @transform_3, window_bounds = array<i64: 32, 96>}, {pipeline_mode = #tpu.pipeline_mode<synchronous>, transform_indices = @transform_4, window_bounds = array<i64: 4, 8, 32>}, {pipeline_mode = #tpu.pipeline_mode<synchronous>, transform_indices = @transform_5, window_bounds = array<i64: 1, 32>}, {pipeline_mode = #tpu.pipeline_mode<synchronous>, transform_indices = @transform_6, window_bounds = array<i64: 32, 32>}, {pipeline_mode = #tpu.pipeline_mode<synchronous>, transform_indices = @transform_7, window_bounds = array<i64: 32, 64>}, {pipeline_mode = #tpu.pipeline_mode<synchronous>, transform_indices = @transform_8, window_bounds = array<i64: 4, 8, 32>}, {pipeline_mode = #tpu.pipeline_mode<synchronous>, transform_indices = @transform_9, window_bounds = array<i64: 1, 32>}, {pipeline_mode = #tpu.pipeline_mode<synchronous>, transform_indices = @transform_10, window_bounds = array<i64: 1, 32>}, {pipeline_mode = #tpu.pipeline_mode<synchronous>, transform_indices = @transform_11, window_bounds = array<i64: 1, 32>}, {pipeline_mode = #tpu.pipeline_mode<synchronous>, transform_indices = @transform_12, window_bounds = array<i64: 1, 32>}, {pipeline_mode = #tpu.pipeline_mode<synchronous>, transform_indices = @transform_13, window_bounds = array<i64: 1, 32>}, {pipeline_mode = #tpu.pipeline_mode<synchronous>, transform_indices = @transform_14, window_bounds = array<i64: 1, 32>}, {pipeline_mode = #tpu.pipeline_mode<synchronous>, transform_indices = @transform_15, window_bounds = array<i64: 1, 32>}, {pipeline_mode = #tpu.pipeline_mode<synchronous>, transform_indices = @transform_16, window_bounds = array<i64: 32, 64>}, {pipeline_mode = #tpu.pipeline_mode<synchronous>, transform_indices = @transform_17, window_bounds = array<i64: 1, 64>}, {pipeline_mode = #tpu.pipeline_mode<synchronous>, transform_indices = @transform_18, window_bounds = array<i64: 64, 32>}, {pipeline_mode = #tpu.pipeline_mode<synchronous>, transform_indices = @transform_19, window_bounds = array<i64: 1, 32>}, {transform_indices = @transform_20, window_bounds = array<i64: 1, 8, 32>}]} {
    %c0 = arith.constant 0 : index
    %c0_0 = arith.constant 0 : index
    %c0_1 = arith.constant 0 : index
    %0 = vector.load %arg1[%c0, %c0_0, %c0_1] : memref<1x8x32xf32, #tpu.memory_space<vmem>>, vector<1x8x32xf32>
    %1 = vector.shape_cast %0 : vector<1x8x32xf32> to vector<8x32xf32>
    %c0_2 = arith.constant 0 : index
    %c0_3 = arith.constant 0 : index
    %c0_4 = arith.constant 0 : index
    %2 = vector.load %arg2[%c0_2, %c0_3, %c0_4] : memref<1x8x32xf32, #tpu.memory_space<vmem>>, vector<1x8x32xf32>
    %3 = vector.shape_cast %2 : vector<1x8x32xf32> to vector<8x32xf32>
    %c0_5 = arith.constant 0 : index
    %c0_6 = arith.constant 0 : index
    %4 = vector.load %arg3[%c0_5, %c0_6] : memref<8x8xf32, #tpu.memory_space<vmem>>, vector<8x8xf32>
    %cst = arith.constant 0.000000e+00 : f32
    %5 = vector.broadcast %cst : f32 to vector<8x8xf32>
    %6 = arith.cmpf oeq, %4, %5 : vector<8x8xf32>
    %cst_7 = arith.constant -1.000000e+30 : f32
    %cst_8 = arith.constant 0.000000e+00 : f32
    %7 = vector.broadcast %cst_7 : f32 to vector<8x8xf32>
    %8 = vector.broadcast %cst_8 : f32 to vector<8x8xf32>
    %9 = arith.select %6, %7, %8 : vector<8x8xi1>, vector<8x8xf32>
    %c0_9 = arith.constant 0 : index
    %c0_10 = arith.constant 0 : index
    %10 = vector.load %arg11[%c0_9, %c0_10] : memref<1x32xf32, #tpu.memory_space<vmem>>, vector<1x32xf32>
    %c0_11 = arith.constant 0 : index
    %c0_12 = arith.constant 0 : index
    %11 = vector.load %arg12[%c0_11, %c0_12] : memref<1x32xf32, #tpu.memory_space<vmem>>, vector<1x32xf32>
    %cst_13 = arith.constant dense<0.000000e+00> : vector<8xf32>
    %12 = vector.multi_reduction <add>, %1, %cst_13 [1] : vector<8x32xf32> to vector<8xf32>
    %13 = vector.shape_cast %12 : vector<8xf32> to vector<8x1xf32>
    %cst_14 = arith.constant 3.200000e+01 : f32
    %14 = vector.broadcast %cst_14 : f32 to vector<8x1xf32>
    %15 = arith.divf %13, %14 : vector<8x1xf32>
    %16 = vector.broadcast %15 : vector<8x1xf32> to vector<8x32xf32>
    %17 = arith.subf %1, %16 : vector<8x32xf32>
    %18 = arith.mulf %17, %17 : vector<8x32xf32>
    %cst_15 = arith.constant dense<0.000000e+00> : vector<8xf32>
    %19 = vector.multi_reduction <add>, %18, %cst_15 [1] : vector<8x32xf32> to vector<8xf32>
    %20 = vector.shape_cast %19 : vector<8xf32> to vector<8x1xf32>
    %cst_16 = arith.constant 3.200000e+01 : f32
    %21 = vector.broadcast %cst_16 : f32 to vector<8x1xf32>
    %22 = arith.divf %20, %21 : vector<8x1xf32>
    %23 = vector.broadcast %15 : vector<8x1xf32> to vector<8x32xf32>
    %24 = arith.subf %1, %23 : vector<8x32xf32>
    %cst_17 = arith.constant 9.99999974E-6 : f32
    %25 = vector.broadcast %cst_17 : f32 to vector<8x1xf32>
    %26 = arith.addf %22, %25 : vector<8x1xf32>
    %27 = math.rsqrt %26 : vector<8x1xf32>
    %28 = vector.broadcast %27 : vector<8x1xf32> to vector<8x32xf32>
    %29 = arith.mulf %24, %28 : vector<8x32xf32>
    %30 = vector.broadcast %10 : vector<1x32xf32> to vector<8x32xf32>
    %31 = arith.mulf %29, %30 : vector<8x32xf32>
    %32 = vector.broadcast %11 : vector<1x32xf32> to vector<8x32xf32>
    %33 = arith.addf %31, %32 : vector<8x32xf32>
    %c0_18 = arith.constant 0 : index
    %c0_19 = arith.constant 0 : index
    %34 = vector.load %arg4[%c0_18, %c0_19] : memref<32x96xf32, #tpu.memory_space<vmem>>, vector<32x96xf32>
    %cst_20 = arith.constant dense<0.000000e+00> : vector<8x96xf32>
    %35 = tpu.matmul %33, %34, %cst_20 {dimension_numbers = #tpu.dot_dimension_numbers<[1], [0], [0], [1], [0, 0, 1, 1], [], []>} : vector<8x32xf32>, vector<32x96xf32>, vector<8x96xf32> -> vector<8x96xf32>
    %36 = tpu.transpose %35, [1, 0] : vector<8x96xf32> -> vector<96x8xf32>
    %37 = vector.shape_cast %36 : vector<96x8xf32> to vector<12x8x8xf32>
    %38 = tpu.transpose %37, [0, 2, 1] : vector<12x8x8xf32> -> vector<12x8x8xf32>
    %39 = vector.extract_strided_slice %38 {offsets = [0, 0, 0], sizes = [4, 8, 8], strides = [1, 1, 1]} : vector<12x8x8xf32> to vector<4x8x8xf32>
    %40 = vector.extract_strided_slice %38 {offsets = [4, 0, 0], sizes = [4, 8, 8], strides = [1, 1, 1]} : vector<12x8x8xf32> to vector<4x8x8xf32>
    %41 = vector.extract_strided_slice %38 {offsets = [8, 0, 0], sizes = [4, 8, 8], strides = [1, 1, 1]} : vector<12x8x8xf32> to vector<4x8x8xf32>
    %c0_21 = arith.constant 0 : index
    %c0_22 = arith.constant 0 : index
    %c0_23 = arith.constant 0 : index
    %42 = vector.load %arg5[%c0_21, %c0_22, %c0_23] : memref<4x8x32xf32, #tpu.memory_space<vmem>>, vector<4x8x32xf32>
    %c0_24 = arith.constant 0 : index
    %c0_25 = arith.constant 0 : index
    %43 = vector.load %arg6[%c0_24, %c0_25] : memref<1x32xf32, #tpu.memory_space<vmem>>, vector<1x32xf32>
    %cst_26 = arith.constant 0.353553385 : f32
    %44 = vector.broadcast %cst_26 : f32 to vector<4x8x8xf32>
    %45 = arith.mulf %39, %44 : vector<4x8x8xf32>
    "tpu.trace_start"() <{level = 10 : i32, message = "hqd,hkd->hqk"}> : () -> ()
    %cst_27 = arith.constant dense<0.000000e+00> : vector<4x8x8xf32>
    %46 = tpu.matmul %45, %40, %cst_27 {dimension_numbers = #tpu.dot_dimension_numbers<[2], [2], [1], [1], [0, 0, 0, 1, 1, 1], [0], [0]>} : vector<4x8x8xf32>, vector<4x8x8xf32>, vector<4x8x8xf32> -> vector<4x8x8xf32>
    "tpu.trace_stop"() : () -> ()
    %47 = vector.shape_cast %9 : vector<8x8xf32> to vector<1x8x8xf32>
    %48 = vector.broadcast %47 : vector<1x8x8xf32> to vector<4x8x8xf32>
    %49 = arith.addf %46, %48 : vector<4x8x8xf32>
    %cst_28 = arith.constant dense<0xFF800000> : vector<4x8xf32>
    %50 = vector.multi_reduction <maximumf>, %49, %cst_28 [2] : vector<4x8x8xf32> to vector<4x8xf32>
    %51 = vector.shape_cast %50 : vector<4x8xf32> to vector<4x8x1xf32>
    %52 = vector.broadcast %51 : vector<4x8x1xf32> to vector<4x8x8xf32>
    %53 = arith.subf %49, %52 : vector<4x8x8xf32>
    %54 = math.exp %53 : vector<4x8x8xf32>
    %cst_29 = arith.constant dense<0.000000e+00> : vector<4x8xf32>
    %55 = vector.multi_reduction <add>, %54, %cst_29 [2] : vector<4x8x8xf32> to vector<4x8xf32>
    %56 = vector.shape_cast %55 : vector<4x8xf32> to vector<4x8x1xf32>
    "tpu.trace_start"() <{level = 10 : i32, message = "hqk,hkd->hqd"}> : () -> ()
    %cst_30 = arith.constant dense<0.000000e+00> : vector<4x8x8xf32>
    %57 = tpu.matmul %54, %41, %cst_30 {dimension_numbers = #tpu.dot_dimension_numbers<[2], [1], [1], [2], [0, 0, 0, 1, 1, 2], [0], [0]>} : vector<4x8x8xf32>, vector<4x8x8xf32>, vector<4x8x8xf32> -> vector<4x8x8xf32>
    "tpu.trace_stop"() : () -> ()
    %58 = tpu.reciprocal %56 {approx = true} : vector<4x8x1xf32> -> vector<4x8x1xf32>
    %59 = vector.broadcast %58 : vector<4x8x1xf32> to vector<4x8x8xf32>
    %60 = arith.mulf %57, %59 : vector<4x8x8xf32>
    "tpu.trace_start"() <{level = 10 : i32, message = "hqd,hdn->hqn"}> : () -> ()
    %cst_31 = arith.constant dense<0.000000e+00> : vector<4x8x32xf32>
    %61 = tpu.matmul %60, %42, %cst_31 {dimension_numbers = #tpu.dot_dimension_numbers<[2], [1], [1], [2], [0, 0, 0, 1, 1, 2], [0], [0]>} : vector<4x8x8xf32>, vector<4x8x32xf32>, vector<4x8x32xf32> -> vector<4x8x32xf32>
    "tpu.trace_stop"() : () -> ()
    %cst_32 = arith.constant dense<0.000000e+00> : vector<8x32xf32>
    %62 = vector.multi_reduction <add>, %61, %cst_32 [0] : vector<4x8x32xf32> to vector<8x32xf32>
    %63 = vector.broadcast %43 : vector<1x32xf32> to vector<8x32xf32>
    %64 = arith.addf %62, %63 : vector<8x32xf32>
    %65 = arith.addf %33, %64 : vector<8x32xf32>
    %c0_33 = arith.constant 0 : index
    %c0_34 = arith.constant 0 : index
    %66 = vector.load %arg13[%c0_33, %c0_34] : memref<1x32xf32, #tpu.memory_space<vmem>>, vector<1x32xf32>
    %c0_35 = arith.constant 0 : index
    %c0_36 = arith.constant 0 : index
    %67 = vector.load %arg14[%c0_35, %c0_36] : memref<1x32xf32, #tpu.memory_space<vmem>>, vector<1x32xf32>
    %cst_37 = arith.constant dense<0.000000e+00> : vector<8xf32>
    %68 = vector.multi_reduction <add>, %65, %cst_37 [1] : vector<8x32xf32> to vector<8xf32>
    %69 = vector.shape_cast %68 : vector<8xf32> to vector<8x1xf32>
    %cst_38 = arith.constant 3.200000e+01 : f32
    %70 = vector.broadcast %cst_38 : f32 to vector<8x1xf32>
    %71 = arith.divf %69, %70 : vector<8x1xf32>
    %72 = vector.broadcast %71 : vector<8x1xf32> to vector<8x32xf32>
    %73 = arith.subf %65, %72 : vector<8x32xf32>
    %74 = arith.mulf %73, %73 : vector<8x32xf32>
    %cst_39 = arith.constant dense<0.000000e+00> : vector<8xf32>
    %75 = vector.multi_reduction <add>, %74, %cst_39 [1] : vector<8x32xf32> to vector<8xf32>
    %76 = vector.shape_cast %75 : vector<8xf32> to vector<8x1xf32>
    %cst_40 = arith.constant 3.200000e+01 : f32
    %77 = vector.broadcast %cst_40 : f32 to vector<8x1xf32>
    %78 = arith.divf %76, %77 : vector<8x1xf32>
    %79 = vector.broadcast %71 : vector<8x1xf32> to vector<8x32xf32>
    %80 = arith.subf %65, %79 : vector<8x32xf32>
    %cst_41 = arith.constant 9.99999974E-6 : f32
    %81 = vector.broadcast %cst_41 : f32 to vector<8x1xf32>
    %82 = arith.addf %78, %81 : vector<8x1xf32>
    %83 = math.rsqrt %82 : vector<8x1xf32>
    %84 = vector.broadcast %83 : vector<8x1xf32> to vector<8x32xf32>
    %85 = arith.mulf %80, %84 : vector<8x32xf32>
    %86 = vector.broadcast %66 : vector<1x32xf32> to vector<8x32xf32>
    %87 = arith.mulf %85, %86 : vector<8x32xf32>
    %88 = vector.broadcast %67 : vector<1x32xf32> to vector<8x32xf32>
    %89 = arith.addf %87, %88 : vector<8x32xf32>
    %c0_42 = arith.constant 0 : index
    %c0_43 = arith.constant 0 : index
    %90 = vector.load %arg7[%c0_42, %c0_43] : memref<32x32xf32, #tpu.memory_space<vmem>>, vector<32x32xf32>
    %cst_44 = arith.constant dense<0.000000e+00> : vector<8x32xf32>
    %91 = tpu.matmul %89, %90, %cst_44 {dimension_numbers = #tpu.dot_dimension_numbers<[1], [0], [0], [1], [0, 0, 1, 1], [], []>} : vector<8x32xf32>, vector<32x32xf32>, vector<8x32xf32> -> vector<8x32xf32>
    %92 = tpu.transpose %91, [1, 0] : vector<8x32xf32> -> vector<32x8xf32>
    %93 = vector.shape_cast %92 : vector<32x8xf32> to vector<4x8x8xf32>
    %94 = tpu.transpose %93, [0, 2, 1] : vector<4x8x8xf32> -> vector<4x8x8xf32>
    %c0_45 = arith.constant 0 : index
    %c0_46 = arith.constant 0 : index
    %95 = vector.load %arg8[%c0_45, %c0_46] : memref<32x64xf32, #tpu.memory_space<vmem>>, vector<32x64xf32>
    %cst_47 = arith.constant dense<0.000000e+00> : vector<8x64xf32>
    %96 = tpu.matmul %3, %95, %cst_47 {dimension_numbers = #tpu.dot_dimension_numbers<[1], [0], [0], [1], [0, 0, 1, 1], [], []>} : vector<8x32xf32>, vector<32x64xf32>, vector<8x64xf32> -> vector<8x64xf32>
    %97 = tpu.transpose %96, [1, 0] : vector<8x64xf32> -> vector<64x8xf32>
    %98 = vector.shape_cast %97 : vector<64x8xf32> to vector<8x8x8xf32>
    %99 = tpu.transpose %98, [0, 2, 1] : vector<8x8x8xf32> -> vector<8x8x8xf32>
    %100 = vector.extract_strided_slice %99 {offsets = [0, 0, 0], sizes = [4, 8, 8], strides = [1, 1, 1]} : vector<8x8x8xf32> to vector<4x8x8xf32>
    %101 = vector.extract_strided_slice %99 {offsets = [4, 0, 0], sizes = [4, 8, 8], strides = [1, 1, 1]} : vector<8x8x8xf32> to vector<4x8x8xf32>
    %c0_48 = arith.constant 0 : index
    %c0_49 = arith.constant 0 : index
    %c0_50 = arith.constant 0 : index
    %102 = vector.load %arg9[%c0_48, %c0_49, %c0_50] : memref<4x8x32xf32, #tpu.memory_space<vmem>>, vector<4x8x32xf32>
    %c0_51 = arith.constant 0 : index
    %c0_52 = arith.constant 0 : index
    %103 = vector.load %arg10[%c0_51, %c0_52] : memref<1x32xf32, #tpu.memory_space<vmem>>, vector<1x32xf32>
    %cst_53 = arith.constant 0.353553385 : f32
    %104 = vector.broadcast %cst_53 : f32 to vector<4x8x8xf32>
    %105 = arith.mulf %94, %104 : vector<4x8x8xf32>
    "tpu.trace_start"() <{level = 10 : i32, message = "hqd,hkd->hqk"}> : () -> ()
    %cst_54 = arith.constant dense<0.000000e+00> : vector<4x8x8xf32>
    %106 = tpu.matmul %105, %100, %cst_54 {dimension_numbers = #tpu.dot_dimension_numbers<[2], [2], [1], [1], [0, 0, 0, 1, 1, 1], [0], [0]>} : vector<4x8x8xf32>, vector<4x8x8xf32>, vector<4x8x8xf32> -> vector<4x8x8xf32>
    "tpu.trace_stop"() : () -> ()
    %cst_55 = arith.constant dense<0xFF800000> : vector<4x8xf32>
    %107 = vector.multi_reduction <maximumf>, %106, %cst_55 [2] : vector<4x8x8xf32> to vector<4x8xf32>
    %108 = vector.shape_cast %107 : vector<4x8xf32> to vector<4x8x1xf32>
    %109 = vector.broadcast %108 : vector<4x8x1xf32> to vector<4x8x8xf32>
    %110 = arith.subf %106, %109 : vector<4x8x8xf32>
    %111 = math.exp %110 : vector<4x8x8xf32>
    %cst_56 = arith.constant dense<0.000000e+00> : vector<4x8xf32>
    %112 = vector.multi_reduction <add>, %111, %cst_56 [2] : vector<4x8x8xf32> to vector<4x8xf32>
    %113 = vector.shape_cast %112 : vector<4x8xf32> to vector<4x8x1xf32>
    "tpu.trace_start"() <{level = 10 : i32, message = "hqk,hkd->hqd"}> : () -> ()
    %cst_57 = arith.constant dense<0.000000e+00> : vector<4x8x8xf32>
    %114 = tpu.matmul %111, %101, %cst_57 {dimension_numbers = #tpu.dot_dimension_numbers<[2], [1], [1], [2], [0, 0, 0, 1, 1, 2], [0], [0]>} : vector<4x8x8xf32>, vector<4x8x8xf32>, vector<4x8x8xf32> -> vector<4x8x8xf32>
    "tpu.trace_stop"() : () -> ()
    %115 = tpu.reciprocal %113 {approx = true} : vector<4x8x1xf32> -> vector<4x8x1xf32>
    %116 = vector.broadcast %115 : vector<4x8x1xf32> to vector<4x8x8xf32>
    %117 = arith.mulf %114, %116 : vector<4x8x8xf32>
    "tpu.trace_start"() <{level = 10 : i32, message = "hqd,hdn->hqn"}> : () -> ()
    %cst_58 = arith.constant dense<0.000000e+00> : vector<4x8x32xf32>
    %118 = tpu.matmul %117, %102, %cst_58 {dimension_numbers = #tpu.dot_dimension_numbers<[2], [1], [1], [2], [0, 0, 0, 1, 1, 2], [0], [0]>} : vector<4x8x8xf32>, vector<4x8x32xf32>, vector<4x8x32xf32> -> vector<4x8x32xf32>
    "tpu.trace_stop"() : () -> ()
    %cst_59 = arith.constant dense<0.000000e+00> : vector<8x32xf32>
    %119 = vector.multi_reduction <add>, %118, %cst_59 [0] : vector<4x8x32xf32> to vector<8x32xf32>
    %120 = vector.broadcast %103 : vector<1x32xf32> to vector<8x32xf32>
    %121 = arith.addf %119, %120 : vector<8x32xf32>
    %122 = arith.addf %89, %121 : vector<8x32xf32>
    %c0_60 = arith.constant 0 : index
    %c0_61 = arith.constant 0 : index
    %123 = vector.load %arg15[%c0_60, %c0_61] : memref<1x32xf32, #tpu.memory_space<vmem>>, vector<1x32xf32>
    %c0_62 = arith.constant 0 : index
    %c0_63 = arith.constant 0 : index
    %124 = vector.load %arg16[%c0_62, %c0_63] : memref<1x32xf32, #tpu.memory_space<vmem>>, vector<1x32xf32>
    %cst_64 = arith.constant dense<0.000000e+00> : vector<8xf32>
    %125 = vector.multi_reduction <add>, %122, %cst_64 [1] : vector<8x32xf32> to vector<8xf32>
    %126 = vector.shape_cast %125 : vector<8xf32> to vector<8x1xf32>
    %cst_65 = arith.constant 3.200000e+01 : f32
    %127 = vector.broadcast %cst_65 : f32 to vector<8x1xf32>
    %128 = arith.divf %126, %127 : vector<8x1xf32>
    %129 = vector.broadcast %128 : vector<8x1xf32> to vector<8x32xf32>
    %130 = arith.subf %122, %129 : vector<8x32xf32>
    %131 = arith.mulf %130, %130 : vector<8x32xf32>
    %cst_66 = arith.constant dense<0.000000e+00> : vector<8xf32>
    %132 = vector.multi_reduction <add>, %131, %cst_66 [1] : vector<8x32xf32> to vector<8xf32>
    %133 = vector.shape_cast %132 : vector<8xf32> to vector<8x1xf32>
    %cst_67 = arith.constant 3.200000e+01 : f32
    %134 = vector.broadcast %cst_67 : f32 to vector<8x1xf32>
    %135 = arith.divf %133, %134 : vector<8x1xf32>
    %136 = vector.broadcast %128 : vector<8x1xf32> to vector<8x32xf32>
    %137 = arith.subf %122, %136 : vector<8x32xf32>
    %cst_68 = arith.constant 9.99999974E-6 : f32
    %138 = vector.broadcast %cst_68 : f32 to vector<8x1xf32>
    %139 = arith.addf %135, %138 : vector<8x1xf32>
    %140 = math.rsqrt %139 : vector<8x1xf32>
    %141 = vector.broadcast %140 : vector<8x1xf32> to vector<8x32xf32>
    %142 = arith.mulf %137, %141 : vector<8x32xf32>
    %143 = vector.broadcast %123 : vector<1x32xf32> to vector<8x32xf32>
    %144 = arith.mulf %142, %143 : vector<8x32xf32>
    %145 = vector.broadcast %124 : vector<1x32xf32> to vector<8x32xf32>
    %146 = arith.addf %144, %145 : vector<8x32xf32>
    %c0_69 = arith.constant 0 : index
    %c0_70 = arith.constant 0 : index
    %147 = vector.load %arg17[%c0_69, %c0_70] : memref<32x64xf32, #tpu.memory_space<vmem>>, vector<32x64xf32>
    %cst_71 = arith.constant dense<0.000000e+00> : vector<8x64xf32>
    %148 = tpu.matmul %146, %147, %cst_71 {dimension_numbers = #tpu.dot_dimension_numbers<[1], [0], [0], [1], [0, 0, 1, 1], [], []>} : vector<8x32xf32>, vector<32x64xf32>, vector<8x64xf32> -> vector<8x64xf32>
    %c0_72 = arith.constant 0 : index
    %c0_73 = arith.constant 0 : index
    %149 = vector.load %arg18[%c0_72, %c0_73] : memref<1x64xf32, #tpu.memory_space<vmem>>, vector<1x64xf32>
    %150 = vector.broadcast %149 : vector<1x64xf32> to vector<8x64xf32>
    %151 = arith.addf %148, %150 : vector<8x64xf32>
    %cst_74 = arith.constant 0.000000e+00 : f32
    %152 = vector.broadcast %cst_74 : f32 to vector<8x64xf32>
    %153 = arith.maximumf %151, %152 : vector<8x64xf32>
    %c0_75 = arith.constant 0 : index
    %c0_76 = arith.constant 0 : index
    %154 = vector.load %arg19[%c0_75, %c0_76] : memref<64x32xf32, #tpu.memory_space<vmem>>, vector<64x32xf32>
    %cst_77 = arith.constant dense<0.000000e+00> : vector<8x32xf32>
    %155 = tpu.matmul %153, %154, %cst_77 {dimension_numbers = #tpu.dot_dimension_numbers<[1], [0], [0], [1], [0, 0, 1, 1], [], []>} : vector<8x64xf32>, vector<64x32xf32>, vector<8x32xf32> -> vector<8x32xf32>
    %c0_78 = arith.constant 0 : index
    %c0_79 = arith.constant 0 : index
    %156 = vector.load %arg20[%c0_78, %c0_79] : memref<1x32xf32, #tpu.memory_space<vmem>>, vector<1x32xf32>
    %157 = vector.broadcast %156 : vector<1x32xf32> to vector<8x32xf32>
    %158 = arith.addf %155, %157 : vector<8x32xf32>
    %159 = arith.addf %122, %158 : vector<8x32xf32>
    %c0_80 = arith.constant 0 : index
    %c0_81 = arith.constant 0 : index
    %c0_82 = arith.constant 0 : index
    %160 = vector.load %arg21[%c0_80, %c0_81, %c0_82] : memref<1x8x32xf32, #tpu.memory_space<vmem>>, vector<1x8x32xf32>
    %161 = vector.shape_cast %160 : vector<1x8x32xf32> to vector<8x32xf32>
    %162 = vector.shape_cast %159 : vector<8x32xf32> to vector<1x8x32xf32>
    tpu.vector_store %arg21[%c0_80, %c0_81, %c0_82], %162 {strides = array<i32>} : memref<1x8x32xf32, #tpu.memory_space<vmem>>, vector<1x8x32xf32>,
    return
  }
  func.func @transform_0(%arg0: i32) -> (i32, i32, i32) {
    %c0_i32 = arith.constant 0 : i32
    %c0_i32_0 = arith.constant 0 : i32
    %c0_i32_1 = arith.constant 0 : i32
    return %arg0, %c0_i32, %c0_i32_0 : i32, i32, i32
  }
  func.func @transform_1(%arg0: i32) -> (i32, i32, i32) {
    %c0_i32 = arith.constant 0 : i32
    %c0_i32_0 = arith.constant 0 : i32
    %c0_i32_1 = arith.constant 0 : i32
    return %arg0, %c0_i32, %c0_i32_0 : i32, i32, i32
  }
  func.func @transform_2(%arg0: i32) -> (i32, i32) {
    %c0_i32 = arith.constant 0 : i32
    %c0_i32_0 = arith.constant 0 : i32
    %c0_i32_1 = arith.constant 0 : i32
    return %c0_i32, %c0_i32_0 : i32, i32
  }
  func.func @transform_3(%arg0: i32) -> (i32, i32) {
    %c0_i32 = arith.constant 0 : i32
    %c0_i32_0 = arith.constant 0 : i32
    %c0_i32_1 = arith.constant 0 : i32
    return %c0_i32, %c0_i32_0 : i32, i32
  }
  func.func @transform_4(%arg0: i32) -> (i32, i32, i32) {
    %c0_i32 = arith.constant 0 : i32
    %c0_i32_0 = arith.constant 0 : i32
    %c0_i32_1 = arith.constant 0 : i32
    %c0_i32_2 = arith.constant 0 : i32
    return %c0_i32, %c0_i32_0, %c0_i32_1 : i32, i32, i32
  }
  func.func @transform_5(%arg0: i32) -> (i32, i32) {
    %c0_i32 = arith.constant 0 : i32
    %c0_i32_0 = arith.constant 0 : i32
    %c0_i32_1 = arith.constant 0 : i32
    return %c0_i32, %c0_i32_0 : i32, i32
  }
  func.func @transform_6(%arg0: i32) -> (i32, i32) {
    %c0_i32 = arith.constant 0 : i32
    %c0_i32_0 = arith.constant 0 : i32
    %c0_i32_1 = arith.constant 0 : i32
    return %c0_i32, %c0_i32_0 : i32, i32
  }
  func.func @transform_7(%arg0: i32) -> (i32, i32) {
    %c0_i32 = arith.constant 0 : i32
    %c0_i32_0 = arith.constant 0 : i32
    %c0_i32_1 = arith.constant 0 : i32
    return %c0_i32, %c0_i32_0 : i32, i32
  }
  func.func @transform_8(%arg0: i32) -> (i32, i32, i32) {
    %c0_i32 = arith.constant 0 : i32
    %c0_i32_0 = arith.constant 0 : i32
    %c0_i32_1 = arith.constant 0 : i32
    %c0_i32_2 = arith.constant 0 : i32
    return %c0_i32, %c0_i32_0, %c0_i32_1 : i32, i32, i32
  }
  func.func @transform_9(%arg0: i32) -> (i32, i32) {
    %c0_i32 = arith.constant 0 : i32
    %c0_i32_0 = arith.constant 0 : i32
    %c0_i32_1 = arith.constant 0 : i32
    return %c0_i32, %c0_i32_0 : i32, i32
  }
  func.func @transform_10(%arg0: i32) -> (i32, i32) {
    %c0_i32 = arith.constant 0 : i32
    %c0_i32_0 = arith.constant 0 : i32
    %c0_i32_1 = arith.constant 0 : i32
    return %c0_i32, %c0_i32_0 : i32, i32
  }
  func.func @transform_11(%arg0: i32) -> (i32, i32) {
    %c0_i32 = arith.constant 0 : i32
    %c0_i32_0 = arith.constant 0 : i32
    %c0_i32_1 = arith.constant 0 : i32
    return %c0_i32, %c0_i32_0 : i32, i32
  }
  func.func @transform_12(%arg0: i32) -> (i32, i32) {
    %c0_i32 = arith.constant 0 : i32
    %c0_i32_0 = arith.constant 0 : i32
    %c0_i32_1 = arith.constant 0 : i32
    return %c0_i32, %c0_i32_0 : i32, i32
  }
  func.func @transform_13(%arg0: i32) -> (i32, i32) {
    %c0_i32 = arith.constant 0 : i32
    %c0_i32_0 = arith.constant 0 : i32
    %c0_i32_1 = arith.constant 0 : i32
    return %c0_i32, %c0_i32_0 : i32, i32
  }
  func.func @transform_14(%arg0: i32) -> (i32, i32) {
    %c0_i32 = arith.constant 0 : i32
    %c0_i32_0 = arith.constant 0 : i32
    %c0_i32_1 = arith.constant 0 : i32
    return %c0_i32, %c0_i32_0 : i32, i32
  }
  func.func @transform_15(%arg0: i32) -> (i32, i32) {
    %c0_i32 = arith.constant 0 : i32
    %c0_i32_0 = arith.constant 0 : i32
    %c0_i32_1 = arith.constant 0 : i32
    return %c0_i32, %c0_i32_0 : i32, i32
  }
  func.func @transform_16(%arg0: i32) -> (i32, i32) {
    %c0_i32 = arith.constant 0 : i32
    %c0_i32_0 = arith.constant 0 : i32
    %c0_i32_1 = arith.constant 0 : i32
    return %c0_i32, %c0_i32_0 : i32, i32
  }
  func.func @transform_17(%arg0: i32) -> (i32, i32) {
    %c0_i32 = arith.constant 0 : i32
    %c0_i32_0 = arith.constant 0 : i32
    %c0_i32_1 = arith.constant 0 : i32
    return %c0_i32, %c0_i32_0 : i32, i32
  }
  func.func @transform_18(%arg0: i32) -> (i32, i32) {
    %c0_i32 = arith.constant 0 : i32
    %c0_i32_0 = arith.constant 0 : i32
    %c0_i32_1 = arith.constant 0 : i32
    return %c0_i32, %c0_i32_0 : i32, i32
  }
  func.func @transform_19(%arg0: i32) -> (i32, i32) {
    %c0_i32 = arith.constant 0 : i32
    %c0_i32_0 = arith.constant 0 : i32
    %c0_i32_1 = arith.constant 0 : i32
    return %c0_i32, %c0_i32_0 : i32, i32
  }
  func.func @transform_20(%arg0: i32) -> (i32, i32, i32) {
    %c0_i32 = arith.constant 0 : i32
    %c0_i32_0 = arith.constant 0 : i32
    %c0_i32_1 = arith.constant 0 : i32
    return %arg0, %c0_i32, %c0_i32_0 : i32, i32, i32
  }
}

</mosaic_0001>

<bundles_post_ra>
// kernel: tpu_custom_call.1
= control target key start
LH: loop header
LB: loop body
LE: loop exit
PB: predicated region body
PF: predicated region fallthrough
CT: control target
= control target key end

     0   :  { %s6032_s0 = inlined_call_operand.hbm [shape: f32[2,8,32], index: 0, kind: input, shape index: {}]   ;;  %s6033_s1 = inlined_call_operand.hbm [shape: f32[2,8,32], index: 1, kind: input, shape index: {}]   ;;  %s6034_s2 = inlined_call_operand.hbm [shape: f32[8,8], index: 2, kind: input, shape index: {}]   ;;  %s6035_s3 = inlined_call_operand.vmem [shape: f32[32,96], index: 3, kind: input, shape index: {}]   ;;  %s6036_s4 = inlined_call_operand.vmem [shape: f32[4,8,32], index: 4, kind: input, shape index: {}]   ;;  %s6037_s5 = inlined_call_operand.hbm [shape: f32[1,32], index: 5, kind: input, shape index: {}]   ;;  %s6038_s6 = inlined_call_operand.vmem [shape: f32[32,32], index: 6, kind: input, shape index: {}]   ;;  %s6039_s7 = inlined_call_operand.hbm [shape: f32[32,64], index: 7, kind: input, shape index: {}]   ;;  %s6040_s8 = inlined_call_operand.hbm [shape: f32[4,8,32], index: 8, kind: input, shape index: {}]   ;;  %s6041_s9 = inlined_call_operand.hbm [shape: f32[1,32], index: 9, kind: input, shape index: {}]   ;;  %s6042_s10 = inlined_call_operand.hbm [shape: f32[1,32], index: 10, kind: input, shape index: {}]   ;;  %s6043_s11 = inlined_call_operand.hbm [shape: f32[1,32], index: 11, kind: input, shape index: {}]   ;;  %s6044_s12 = inlined_call_operand.hbm [shape: f32[1,32], index: 12, kind: input, shape index: {}]   ;;  %s6045_s13 = inlined_call_operand.hbm [shape: f32[1,32], index: 13, kind: input, shape index: {}]   ;;  %s6046_s14 = inlined_call_operand.hbm [shape: f32[1,32], index: 14, kind: input, shape index: {}]   ;;  %s6047_s15 = inlined_call_operand.hbm [shape: f32[1,32], index: 15, kind: input, shape index: {}]   ;;  %s6048_s16 = inlined_call_operand.vmem [shape: f32[32,64], index: 16, kind: input, shape index: {}]   ;;  %s6049_s17 = inlined_call_operand.hbm [shape: f32[1,64], index: 17, kind: input, shape index: {}]   ;;  %s6050_s18 = inlined_call_operand.vmem [shape: f32[64,32], index: 18, kind: input, shape index: {}]   ;;  %s6051_s19 = inlined_call_operand.vmem [shape: f32[1,32], index: 19, kind: input, shape index: {}]   ;;  %s6052_s20 = inlined_call_operand.hbm [shape: f32[2,8,32], index: 20, kind: output, shape index: {}]  }
   0x1   :  { %6072 = sst [smem:[#allocation39_spill]] %s6032_s0 }
   0x2   :  { %6073 = sst [smem:[#allocation40_spill]] %s6033_s1 }
   0x3   :  { %6074 = sst [smem:[#allocation41_spill]] %s6034_s2 }
   0x4   :  { %6075 = sst [smem:[#allocation42_spill]] %s6035_s3 }
   0x5   :  { %6076 = sst [smem:[#allocation43_spill]] %s6036_s4 }
   0x6   :  { %6077 = sst [smem:[#allocation44_spill]] %s6037_s5 }
   0x7   :  { %6078 = sst [smem:[#allocation45_spill]] %s6038_s6 }
   0x8   :  { %6079 = sst [smem:[#allocation46_spill]] %s6039_s7 }
   0x9   :  { %6080 = sst [smem:[#allocation47_spill]] %s6040_s8 }
   0xa   :  { %6081 = sst [smem:[#allocation48_spill]] %s6041_s9 }
   0xb   :  { %6082 = sst [smem:[#allocation49_spill]] %s6042_s10 }
   0xc   :  { %6083 = sst [smem:[#allocation50_spill]] %s6043_s11 }
   0xd   :  { %6084 = sst [smem:[#allocation51_spill]] %s6048_s16 }
   0xe   :  { %6085 = sst [smem:[#allocation52_spill]] %s6050_s18 }
   0xf   :  { %6086 = sst [smem:[#allocation53_spill]] %s6051_s19 }
  0x10   :  { %6087 = sst [smem:[#allocation54_spill]] %s6052_s20 }
  0x11   :  { %25 = vsyncpa [#allocation3], 0 }
  0x12   :  { %27 = vsyncpa [#allocation3 + $0x1], 0 }
  0x13   :  { %28 = vsyncpa [#allocation6], 0 }
  0x14   :  { %30 = vsyncpa [#allocation6 + $0x1], 0 }
  0x15   :  { %31 = vsyncpa [#allocation9], 0 }
  0x16   :  { %32 = vsyncpa [#allocation12], 0 }
  0x17   :  { %33 = vsyncpa [#allocation15], 0 }
  0x18   :  { %34 = vsyncpa [#allocation18], 0 }
  0x19   :  { %35 = vsyncpa [#allocation21], 0 }
  0x1a   :  { %36 = vsyncpa [#allocation24], 0 }
  0x1b   :  { %37 = vsyncpa [#allocation4], 0 }
  0x1c   :  { %39 = vsyncpa [#allocation4 + $0x1], 0  ;;  %s5297_s1 = smov 0   ;;  %s5299_s22 = smov 0  }
  0x1d   :  { %s5301_s23 = smov 0   ;;  %s5303_s24 = smov 0  }
  0x1e LB: > { %6088 = sst [smem:[#allocation36_spill]] %s5158_s1  ;;  %s5172_s2 = smov [#allocation7]   ;;  %s5170_s24 = sphi %s5303_s24, %s6144_s24   ;;  %s5166_s23 = sphi %s5301_s23, %s6143_s23   ;;  %s5162_s22 = sphi %s5299_s22, %s6142_s22   ;;  %s5158_s1 = sphi %s5297_s1, %s6141_s1  }
  0x1f   : > { %s519_s25 = sshll.u32 %s5172_s2, 4  ;;  %s5318_s3 = sadd.s32 4294967295, %s5170_s24   ;;  %s520_s25 = int_to_ptr.vmem [resolvable:$true] %s519_s25 }
  0x20   : > { %6089 = sst [smem:[#allocation37_spill]] %s5318_s3  ;;  %p4080_p0 = scmp.ge.s32.totalorder %s5170_s24, 1 }
  0x21   : > { %p6061_p1 = scmp.eq.s32.totalorder %s5318_s3, 0  ;;  %p506_p2 = scmp.lt.s32.totalorder %s5170_s24, 3 }
  0x22   : > { %s5173_s27 = smov [#allocation8]   ;;  %s5174_s29 = smov [#allocation11]  }
  0x23   : > { %p5323_p3 = pnand %p4080_p0, %p506_p2  ;;  %s536_s28 = sshll.u32 %s5173_s27, 4  ;;  %s5330_s28 = int_to_ptr.vmem [resolvable:$true] %s536_s28 }
  0x24   : > { %s562_s30 = sshll.u32 %s5174_s29, 4  ;;  %s6093_s2 = sld [smem:[#allocation41_spill]]  ;;  %s5338_s30 = int_to_ptr.vmem [resolvable:$true] %s562_s30 }
  0x25   : > { %s6090_s26 = scalar_select %p5323_p3, 1, 0 }
  0x26   : > { %p4515_p5 = pneg %p5323_p3 }
  0x27   : > { %6091 = sst [smem:[#allocation38_spill]] %s6090_s26 }
  0x28   : > { %p5334_p6 = pnand %p4515_p5, %p6061_p1 }
  0x2a   : > { %s4676_s20 = scalar_lea.hbm %s6093_s2, 128  ;;  %p5348_p8 = pneg %p5334_p6 }
  0x2b   : > { %p4677_p7 = scmp.ne.s32.totalorder %s6093_s2, %s4676_s20  ;;  %p4683_p11 = scmp.lt.u32.totalorder %s4676_s20, %s6093_s2 }
  0x2d   : > { %p4679_p9 = pnand %p5348_p8, %p4677_p7 }
  0x2f   : > { %p4680_p10 = pneg %p4679_p9 }
  0x31   : > { %p4685_p12 = pnand %p4683_p11, %p4680_p10 }
  0x33   : > { %4688 = shalt.err (!%p4685_p12)
}
  0x34   : > { %s4689_s0 = scalar_lea.vmem %s520_s25, 128  ;;  %p4697_p5 = scmp.lt.s32.totalorder %s520_s25, %s520_s25 }
  0x35   : > { %p4690_p13 = scmp.ne.s32.totalorder %s520_s25, %s4689_s0  ;;  %p4698_p4 = scmp.lt.s32.totalorder %s4689_s0, %s4689_s0 }
  0x37   : > { %p4692_p0 = pnand %p4690_p13, %p5348_p8  ;;  %p4699_p1 = por %p4698_p4, %p4697_p5 }
  0x39   : > { %p4693_p2 = pneg %p4692_p0 }
  0x3b   : > { %p4700_p3 = pnand %p4699_p1, %p4693_p2 }
  0x3d   : > { %4703 = shalt.err (!%p4700_p3)
}
  0x3e   : > { %4518 = dma.hbm_to_vmem [thread:$0]  (!%p5334_p6), %s6093_s2, 128, %s520_s25, [#allocation6]  }
  0x3f   : > { %s6095_s5 = sld [smem:[#allocation44_spill]] }
  0x45   : > { %s4704_s21 = scalar_lea.hbm %s6095_s5, 16 }
  0x46   : > { %p4705_p7 = scmp.ne.s32.totalorder %s6095_s5, %s4704_s21  ;;  %p4711_p1 = scmp.lt.u32.totalorder %s4704_s21, %s6095_s5 }
  0x48   : > { %p4707_p9 = pnand %p4705_p7, %p5348_p8 }
  0x4a   : > { %p4708_p4 = pneg %p4707_p9 }
  0x4c   : > { %p4713_p3 = pnand %p4711_p1, %p4708_p4 }
  0x4e   : > { %4716 = shalt.err (!%p4713_p3)
}
  0x4f   : > { %s4717_s25 = scalar_lea.vmem %s5330_s28, 16  ;;  %s4724_s6 = scalar_lea.vmem %s5330_s28, 32 }
  0x50   : > { %p4718_p10 = scmp.ne.s32.totalorder %s5330_s28, %s4717_s25  ;;  %p4725_p13 = scmp.lt.s32.totalorder %s5330_s28, %s5330_s28 }
  0x51   : > { %p4726_p0 = scmp.lt.s32.totalorder %s4724_s6, %s4717_s25 }
  0x52   : > { %p4720_p11 = pnand %p4718_p10, %p5348_p8 }
  0x53   : > { %p4727_p2 = por %p4726_p0, %p4725_p13 }
  0x54   : > { %p4721_p12 = pneg %p4720_p11 }
  0x56   : > { %p4728_p5 = pnand %p4727_p2, %p4721_p12 }
  0x58   : > { %4731 = shalt.err (!%p4728_p5)
}
  0x59   : > { %4521 = dma.hbm_to_vmem [thread:$0]  (!%p5334_p6), %s6095_s5, 16, %s5330_s28, [#allocation9]  }
  0x5a   : > { %s6096_s8 = sld [smem:[#allocation47_spill]] }
  0x60   : > { %s4732_s20 = scalar_lea.hbm %s6096_s8, 512 }
  0x61   : > { %p4733_p7 = scmp.ne.s32.totalorder %s6096_s8, %s4732_s20  ;;  %p4739_p1 = scmp.lt.u32.totalorder %s4732_s20, %s6096_s8 }
  0x63   : > { %p4735_p9 = pnand %p4733_p7, %p5348_p8 }
  0x65   : > { %p4736_p4 = pneg %p4735_p9 }
  0x67   : > { %p4741_p3 = pnand %p4739_p1, %p4736_p4 }
  0x69   : > { %4744 = shalt.err (!%p4741_p3)
}
  0x6a   : > { %s4745_s28 = scalar_lea.vmem %s5338_s30, 512  ;;  %p4753_p13 = scmp.lt.s32.totalorder %s5338_s30, %s5338_s30 }
  0x6b   : > { %p4746_p10 = scmp.ne.s32.totalorder %s5338_s30, %s4745_s28  ;;  %p4754_p0 = scmp.lt.s32.totalorder %s4745_s28, %s4745_s28 }
  0x6d   : > { %p4748_p11 = pnand %p4746_p10, %p5348_p8  ;;  %p4755_p2 = por %p4754_p0, %p4753_p13 }
  0x6f   : > { %p4749_p12 = pneg %p4748_p11 }
  0x71   : > { %p4756_p5 = pnand %p4755_p2, %p4749_p12 }
  0x73   : > { %4759 = shalt.err (!%p4756_p5)
}
  0x74   : > { %s5175_s6 = smov 128   ;;  %s5176_s26 = smov 8  }
  0x75   : > { %4527 = dma.hbm_to_vmem [thread:$0]  (!%p5334_p6), %s6096_s8, 512, %s5338_s30, [#allocation12], %s5175_s6, %s5175_s6, %s5176_s26  }
  0x76   : > { %s5177_s16 = smov [#allocation14]   ;;  %s5178_s21 = smov [#allocation17]  }
  0x77   : > { %s587_s20 = sshll.u32 %s5177_s16, 4  ;;  %s609_s29 = sshll.u32 %s5178_s21, 4  ;;  %s588_s20 = int_to_ptr.vmem [resolvable:$true] %s587_s20  ;;  %s610_s29 = int_to_ptr.vmem [resolvable:$true] %s609_s29 }
  0x78   : > { %s6097_s10 = sld [smem:[#allocation49_spill]] }
  0x7e   : > { %s4760_s28 = scalar_lea.hbm %s6097_s10, 16 }
  0x7f   : > { %p4761_p7 = scmp.ne.s32.totalorder %s6097_s10, %s4760_s28  ;;  %p4767_p1 = scmp.lt.u32.totalorder %s4760_s28, %s6097_s10 }
  0x81   : > { %p4763_p9 = pnand %p4761_p7, %p5348_p8 }
  0x83   : > { %p4764_p4 = pneg %p4763_p9 }
  0x85   : > { %p4769_p3 = pnand %p4767_p1, %p4764_p4 }
  0x87   : > { %4772 = shalt.err (!%p4769_p3)
}
  0x88   : > { %s4773_s30 = scalar_lea.vmem %s588_s20, 16  ;;  %s4780_s18 = scalar_lea.vmem %s588_s20, 32 }
  0x89   : > { %p4774_p10 = scmp.ne.s32.totalorder %s588_s20, %s4773_s30  ;;  %p4781_p13 = scmp.lt.s32.totalorder %s588_s20, %s588_s20 }
  0x8a   : > { %p4782_p0 = scmp.lt.s32.totalorder %s4780_s18, %s4773_s30 }
  0x8b   : > { %p4776_p11 = pnand %p4774_p10, %p5348_p8 }
  0x8c   : > { %p4783_p2 = por %p4782_p0, %p4781_p13 }
  0x8d   : > { %p4777_p12 = pneg %p4776_p11 }
  0x8f   : > { %p4784_p5 = pnand %p4783_p2, %p4777_p12 }
  0x91   : > { %4787 = shalt.err (!%p4784_p5)
}
  0x92   : > { %4533 = dma.hbm_to_vmem [thread:$0]  (!%p5334_p6), %s6097_s10, 16, %s588_s20, [#allocation15]  }
  0x93   : > { %s4788_s19 = scalar_lea.hbm %s6044_s12, 16 }
  0x94   : > { %p4789_p7 = scmp.ne.s32.totalorder %s6044_s12, %s4788_s19  ;;  %p4795_p1 = scmp.lt.u32.totalorder %s4788_s19, %s6044_s12 }
  0x96   : > { %p4791_p9 = pnand %p4789_p7, %p5348_p8 }
  0x98   : > { %p4792_p4 = pneg %p4791_p9 }
  0x9a   : > { %p4797_p3 = pnand %p4795_p1, %p4792_p4 }
  0x9c   : > { %4800 = shalt.err (!%p4797_p3)
}
  0x9d   : > { %s4801_s28 = scalar_lea.vmem %s610_s29, 16  ;;  %s4808_s20 = scalar_lea.vmem %s610_s29, 32 }
  0x9e   : > { %p4802_p10 = scmp.ne.s32.totalorder %s610_s29, %s4801_s28  ;;  %p4809_p13 = scmp.lt.s32.totalorder %s610_s29, %s610_s29 }
  0x9f   : > { %p4810_p0 = scmp.lt.s32.totalorder %s4808_s20, %s4801_s28 }
  0xa0   : > { %p4804_p11 = pnand %p4802_p10, %p5348_p8 }
  0xa1   : > { %p4811_p2 = por %p4810_p0, %p4809_p13 }
  0xa2   : > { %p4805_p12 = pneg %p4804_p11 }
  0xa4   : > { %p4812_p5 = pnand %p4811_p2, %p4805_p12 }
  0xa6   : > { %4815 = shalt.err (!%p4812_p5)
}
  0xa7   : > { %4539 = dma.hbm_to_vmem [thread:$0]  (!%p5334_p6), %s6044_s12, 16, %s610_s29, [#allocation18]  }
  0xa8   : > { %s5179_s5 = smov [#allocation20]   ;;  %s5180_s1 = smov [#allocation10]  }
  0xa9   : > { %s631_s2 = sshll.u32 %s5179_s5, 4  ;;  %s549_s3 = sshll.u32 %s5180_s1, 4  ;;  %s632_s2 = int_to_ptr.vmem [resolvable:$true] %s631_s2  ;;  %s550_s3 = int_to_ptr.vmem [resolvable:$true] %s549_s3 }
  0xaa   : > { %s4816_s21 = scalar_lea.hbm %s6046_s14, 16 }
  0xab   : > { %p4817_p7 = scmp.ne.s32.totalorder %s6046_s14, %s4816_s21  ;;  %p4823_p1 = scmp.lt.u32.totalorder %s4816_s21, %s6046_s14 }
  0xad   : > { %p4819_p9 = pnand %p4817_p7, %p5348_p8 }
  0xaf   : > { %p4820_p4 = pneg %p4819_p9 }
  0xb1   : > { %p4825_p3 = pnand %p4823_p1, %p4820_p4 }
  0xb3   : > { %4828 = shalt.err (!%p4825_p3)
}
  0xb4   : > { %s4829_s29 = scalar_lea.vmem %s632_s2, 16  ;;  %s4836_s30 = scalar_lea.vmem %s632_s2, 32 }
  0xb5   : > { %p4830_p10 = scmp.ne.s32.totalorder %s632_s2, %s4829_s29  ;;  %p4837_p13 = scmp.lt.s32.totalorder %s632_s2, %s632_s2 }
  0xb6   : > { %p4838_p0 = scmp.lt.s32.totalorder %s4836_s30, %s4829_s29 }
  0xb7   : > { %p4832_p11 = pnand %p4830_p10, %p5348_p8 }
  0xb8   : > { %p4839_p2 = por %p4838_p0, %p4837_p13 }
  0xb9   : > { %p4833_p12 = pneg %p4832_p11 }
  0xbb   : > { %p4840_p5 = pnand %p4839_p2, %p4833_p12 }
  0xbd   : > { %4843 = shalt.err (!%p4840_p5)
}
  0xbe   : > { %4545 = dma.hbm_to_vmem [thread:$0]  (!%p5334_p6), %s6046_s14, 16, %s632_s2, [#allocation21]  }
  0xbf   : > { %s6098_s7 = sld [smem:[#allocation46_spill]] }
  0xc5   : > { %s4844_s16 = scalar_lea.hbm %s6098_s7, 512 }
  0xc6   : > { %p4845_p7 = scmp.ne.s32.totalorder %s6098_s7, %s4844_s16  ;;  %p4851_p1 = scmp.lt.u32.totalorder %s4844_s16, %s6098_s7 }
  0xc8   : > { %p4847_p9 = pnand %p4845_p7, %p5348_p8 }
  0xca   : > { %p4848_p4 = pneg %p4847_p9 }
  0xcc   : > { %p4853_p3 = pnand %p4851_p1, %p4848_p4 }
  0xce   : > { %4856 = shalt.err (!%p4853_p3)
}
  0xcf   : > { %s4857_s20 = scalar_lea.vmem %s550_s3, 512  ;;  %p4865_p13 = scmp.lt.s32.totalorder %s550_s3, %s550_s3 }
  0xd0   : > { %p4858_p10 = scmp.ne.s32.totalorder %s550_s3, %s4857_s20  ;;  %p4866_p0 = scmp.lt.s32.totalorder %s4857_s20, %s4857_s20 }
  0xd2   : > { %p4860_p11 = pnand %p4858_p10, %p5348_p8  ;;  %p4867_p2 = por %p4866_p0, %p4865_p13 }
  0xd4   : > { %p4861_p12 = pneg %p4860_p11 }
  0xd6   : > { %p4868_p5 = pnand %p4867_p2, %p4861_p12 }
  0xd8   : > { %4871 = shalt.err (!%p4868_p5)
}
  0xd9   : > { %4524 = dma.hbm_to_vmem [thread:$0]  (!%p5334_p6), %s6098_s7, 512, %s550_s3, [#allocation9], %s5175_s6, %s5175_s6, %s5176_s26  }
  0xda   : > { %s5181_s30 = smov [#allocation13]   ;;  %s5182_s5 = smov [#allocation16]  }
  0xdb   : > { %s576_s18 = sshll.u32 %s5181_s30, 4  ;;  %s598_s1 = sshll.u32 %s5182_s5, 4  ;;  %s577_s18 = int_to_ptr.vmem [resolvable:$true] %s576_s18  ;;  %s599_s1 = int_to_ptr.vmem [resolvable:$true] %s598_s1 }
  0xdc   : > { %s6099_s9 = sld [smem:[#allocation48_spill]] }
  0xe2   : > { %s4872_s21 = scalar_lea.hbm %s6099_s9, 16 }
  0xe3   : > { %p4873_p7 = scmp.ne.s32.totalorder %s6099_s9, %s4872_s21  ;;  %p4879_p1 = scmp.lt.u32.totalorder %s4872_s21, %s6099_s9 }
  0xe5   : > { %p4875_p9 = pnand %p4873_p7, %p5348_p8 }
  0xe7   : > { %p4876_p4 = pneg %p4875_p9 }
  0xe9   : > { %p4881_p3 = pnand %p4879_p1, %p4876_p4 }
  0xeb   : > { %4884 = shalt.err (!%p4881_p3)
}
  0xec   : > { %s4885_s6 = scalar_lea.vmem %s577_s18, 16  ;;  %s4892_s26 = scalar_lea.vmem %s577_s18, 32 }
  0xed   : > { %p4886_p10 = scmp.ne.s32.totalorder %s577_s18, %s4885_s6  ;;  %p4893_p13 = scmp.lt.s32.totalorder %s577_s18, %s577_s18 }
  0xee   : > { %p4894_p0 = scmp.lt.s32.totalorder %s4892_s26, %s4885_s6 }
  0xef   : > { %p4888_p11 = pnand %p4886_p10, %p5348_p8 }
  0xf0   : > { %p4895_p2 = por %p4894_p0, %p4893_p13 }
  0xf1   : > { %p4889_p12 = pneg %p4888_p11 }
  0xf3   : > { %p4896_p5 = pnand %p4895_p2, %p4889_p12 }
  0xf5   : > { %4899 = shalt.err (!%p4896_p5)
}
  0xf6   : > { %4530 = dma.hbm_to_vmem [thread:$0]  (!%p5334_p6), %s6099_s9, 16, %s577_s18, [#allocation12]  }
  0xf7   : > { %s6100_s11 = sld [smem:[#allocation50_spill]] }
  0xfd   : > { %s4900_s5 = scalar_lea.hbm %s6100_s11, 16 }
  0xfe   : > { %p4901_p7 = scmp.ne.s32.totalorder %s6100_s11, %s4900_s5  ;;  %p4907_p1 = scmp.lt.u32.totalorder %s4900_s5, %s6100_s11 }
 0x100   : > { %p4903_p9 = pnand %p4901_p7, %p5348_p8 }
 0x102   : > { %p4904_p4 = pneg %p4903_p9 }
 0x104   : > { %p4909_p3 = pnand %p4907_p1, %p4904_p4 }
 0x106   : > { %4912 = shalt.err (!%p4909_p3)
}
 0x107   : > { %s4913_s25 = scalar_lea.vmem %s599_s1, 16  ;;  %s4920_s18 = scalar_lea.vmem %s599_s1, 32 }
 0x108   : > { %p4914_p10 = scmp.ne.s32.totalorder %s599_s1, %s4913_s25  ;;  %p4921_p13 = scmp.lt.s32.totalorder %s599_s1, %s599_s1 }
 0x109   : > { %p4922_p0 = scmp.lt.s32.totalorder %s4920_s18, %s4913_s25 }
 0x10a   : > { %p4916_p11 = pnand %p4914_p10, %p5348_p8 }
 0x10b   : > { %p4923_p2 = por %p4922_p0, %p4921_p13 }
 0x10c   : > { %p4917_p12 = pneg %p4916_p11 }
 0x10e   : > { %p4924_p5 = pnand %p4923_p2, %p4917_p12 }
 0x110   : > { %4927 = shalt.err (!%p4924_p5)
}
 0x111   : > { %4536 = dma.hbm_to_vmem [thread:$0]  (!%p5334_p6), %s6100_s11, 16, %s599_s1, [#allocation15]  }
 0x112   : > { %s5183_s6 = smov [#allocation19]   ;;  %s5184_s3 = smov [#allocation22]  }
 0x113   : > { %s620_s26 = sshll.u32 %s5183_s6, 4  ;;  %s642_s2 = sshll.u32 %s5184_s3, 4  ;;  %s621_s26 = int_to_ptr.vmem [resolvable:$true] %s620_s26  ;;  %s643_s2 = int_to_ptr.vmem [resolvable:$true] %s642_s2 }
 0x114   : > { %s4928_s5 = scalar_lea.hbm %s6045_s13, 16 }
 0x115   : > { %p4929_p7 = scmp.ne.s32.totalorder %s6045_s13, %s4928_s5  ;;  %p4935_p1 = scmp.lt.u32.totalorder %s4928_s5, %s6045_s13 }
 0x117   : > { %p4931_p9 = pnand %p4929_p7, %p5348_p8 }
 0x119   : > { %p4932_p4 = pneg %p4931_p9 }
 0x11b   : > { %p4937_p3 = pnand %p4935_p1, %p4932_p4 }
 0x11d   : > { %4940 = shalt.err (!%p4937_p3)
}
 0x11e   : > { %s4941_s1 = scalar_lea.vmem %s621_s26, 16  ;;  %s4948_s25 = scalar_lea.vmem %s621_s26, 32 }
 0x11f   : > { %p4942_p10 = scmp.ne.s32.totalorder %s621_s26, %s4941_s1  ;;  %p4949_p13 = scmp.lt.s32.totalorder %s621_s26, %s621_s26 }
 0x120   : > { %p4950_p0 = scmp.lt.s32.totalorder %s4948_s25, %s4941_s1 }
 0x121   : > { %p4944_p11 = pnand %p4942_p10, %p5348_p8 }
 0x122   : > { %p4951_p2 = por %p4950_p0, %p4949_p13 }
 0x123   : > { %p4945_p12 = pneg %p4944_p11 }
 0x125   : > { %p4952_p5 = pnand %p4951_p2, %p4945_p12 }
 0x127   : > { %4955 = shalt.err (!%p4952_p5)
}
 0x128   : > { %4542 = dma.hbm_to_vmem [thread:$0]  (!%p5334_p6), %s6045_s13, 16, %s621_s26, [#allocation18]  }
 0x129   : > { %s4956_s3 = scalar_lea.hbm %s6047_s15, 16 }
 0x12a   : > { %p4957_p7 = scmp.ne.s32.totalorder %s6047_s15, %s4956_s3  ;;  %p4963_p1 = scmp.lt.u32.totalorder %s4956_s3, %s6047_s15 }
 0x12c   : > { %p4959_p9 = pnand %p4957_p7, %p5348_p8 }
 0x12e   : > { %p4960_p4 = pneg %p4959_p9 }
 0x130   : > { %p4965_p3 = pnand %p4963_p1, %p4960_p4 }
 0x132   : > { %4968 = shalt.err (!%p4965_p3)
}
 0x133   : > { %s4969_s16 = scalar_lea.vmem %s643_s2, 16  ;;  %s4976_s26 = scalar_lea.vmem %s643_s2, 32 }
 0x134   : > { %p4970_p10 = scmp.ne.s32.totalorder %s643_s2, %s4969_s16  ;;  %p4977_p13 = scmp.lt.s32.totalorder %s643_s2, %s643_s2 }
 0x135   : > { %p4978_p0 = scmp.lt.s32.totalorder %s4976_s26, %s4969_s16 }
 0x136   : > { %p4972_p11 = pnand %p4970_p10, %p5348_p8 }
 0x137   : > { %p4979_p2 = por %p4978_p0, %p4977_p13 }
 0x138   : > { %p4973_p12 = pneg %p4972_p11 }
 0x13a   : > { %p4980_p5 = pnand %p4979_p2, %p4973_p12 }
 0x13c   : > { %4983 = shalt.err (!%p4980_p5)
}
 0x13d   : > { %4548 = dma.hbm_to_vmem [thread:$0]  (!%p5334_p6), %s6047_s15, 16, %s643_s2, [#allocation21]  }
 0x13e   : > { %s5185_s1 = smov [#allocation23]   ;;  %s4984_s20 = scalar_lea.hbm %s6049_s17, 16 }
 0x13f   : > { %s656_s25 = sshll.u32 %s5185_s1, 4  ;;  %p4985_p7 = scmp.ne.s32.totalorder %s6049_s17, %s4984_s20  ;;  %s657_s25 = int_to_ptr.vmem [resolvable:$true] %s656_s25 }
 0x140   : > { %p4991_p1 = scmp.lt.u32.totalorder %s4984_s20, %s6049_s17 }
 0x141   : > { %p4987_p9 = pnand %p4985_p7, %p5348_p8 }
 0x143   : > { %p4988_p4 = pneg %p4987_p9 }
 0x145   : > { %p4993_p3 = pnand %p4991_p1, %p4988_p4 }
 0x147   : > { %4996 = shalt.err (!%p4993_p3)
}
 0x148   : > { %s4997_s2 = scalar_lea.vmem %s657_s25, 16  ;;  %s5004_s5 = scalar_lea.vmem %s657_s25, 32 }
 0x149   : > { %p4998_p10 = scmp.ne.s32.totalorder %s657_s25, %s4997_s2  ;;  %p5005_p13 = scmp.lt.s32.totalorder %s657_s25, %s657_s25 }
 0x14a   : > { %p5006_p0 = scmp.lt.s32.totalorder %s5004_s5, %s4997_s2 }
 0x14b   : > { %p5000_p11 = pnand %p4998_p10, %p5348_p8 }
 0x14c   : > { %p5007_p2 = por %p5006_p0, %p5005_p13 }
 0x14d   : > { %p5001_p12 = pneg %p5000_p11 }
 0x14f   : > { %p5008_p5 = pnand %p5007_p2, %p5001_p12 }
 0x151   : > { %5011 = shalt.err (!%p5008_p5)
}
 0x152   : > { %s6101_s27 = sld [smem:[#allocation36_spill]]  ;;  %s6102_s26 = sld [smem:[#allocation37_spill]] }
 0x153   : > { %4551 = dma.hbm_to_vmem [thread:$0]  (!%p5334_p6), %s6049_s17, 16, %s657_s25, [#allocation24]  }
 0x154   : > { %s4079_s21 = sadd.s32 4294967294, %s5170_s24   ;;  %s5581_s4 = sadd.s32 1, %s5170_s24  }
 0x155   : > { %s49_s0 = ssub.s32 %s5170_s24, %s5581_s4  ;;  %s52_s1 = sadd.s32 1, %s5166_s23 }
 0x156   : > { %p50_p8 = scmp.eq.s32.totalorder %s49_s0, 0  ;;  %p59_p7 = scmp.ne.s32.totalorder %s5166_s23, %s5162_s22 }
 0x157   : > { %p60_p9 = scmp.eq.s32.totalorder %s5170_s24, 0  ;;  %p499_p11 = scmp.eq.s32.totalorder %s4079_s21, 1 }
 0x158   : > { %p65_p4 = scmp.ne.s32.totalorder %s5162_s22, %s6101_s27  ;;  %p6104_p3 = scmp.eq.s32.totalorder %s6102_s26, 0 }
 0x159   : > { %s5592_s18 = scalar_select %p50_p8, %s5166_s23, %s52_s1  }
 0x15a   : > { %p5594_p1 = por %p60_p9, %p59_p7  ;;  %p5600_p6 = por %p6104_p3, %p65_p4 }
 0x15b   : > { %p493_p10 = scmp.eq.s32.totalorder %s6102_s26, 1  ;;  %p4575_p12 = scmp.lt.s32.totalorder %s5170_s24, 2 }
 0x15c   : > { %s6105_s25 = scalar_select %p5600_p6, 1, 0 }
 0x15d   : > { %s673_s20 = sand.u32 1, %s5166_s23   ;;  %p5607_p13 = por %p493_p10, %p59_p7 }
 0x15e   : > { %p5611_p0 = por %p499_p11, %p65_p4  ;;  %s5615_s29 = sshll.u32 %s673_s20, 3 }
 0x15f   : > { %s6106_s6 = scalar_select %p5607_p13, 1, 0 }
 0x160   : > { %s6107_s3 = scalar_select %p5611_p0, 1, 0 }
 0x161   : > { %s4095_s30 = sshll.u32 %s5170_s24, 7  ;;  %s6108_s19 = sld [smem:[#allocation39_spill]] }
 0x162   : > { %s677_s27 = scalar_lea.vmem [#allocation2], %s5615_s29  ;;  %p5628_p2 = pnand %p4575_p12, %p5594_p1 }
 0x163   : > { %s684_s26 = sshll.u32 %s677_s27, 4  ;;  %s6110_s7 = sld [smem:[#allocation40_spill]]  ;;  %s5624_s26 = int_to_ptr.vmem [resolvable:$true] %s684_s26 }
 0x164   : > { %s691_s5 = sand.u32 1, %s5170_s24   ;;  %s674_s8 = scalar_lea.sflag [#allocation3], %s673_s20 }
 0x165   : > { %p5014_p8 = pneg %p5628_p2 }
 0x167   : > { %s5621_s16 = scalar_lea.hbm %s6108_s19, %s4095_s30  ;;  %s5017_s10 = scalar_lea.hbm %s6108_s19, 256 }
 0x168   : > { %s5012_s9 = scalar_lea.hbm %s5621_s16, 128  ;;  %p5018_p4 = scmp.lt.u32.totalorder %s5621_s16, %s6108_s19 }
 0x169   : > { %s5635_s2 = scalar_lea.hbm %s6110_s7, %s4095_s30  ;;  %p5013_p5 = scmp.ne.s32.totalorder %s5621_s16, %s5012_s9 }
 0x16a   : > { %p5019_p1 = scmp.lt.u32.totalorder %s5017_s10, %s5012_s9  ;;  %p5021_p10 = scmp.lt.u32.totalorder %s5012_s9, %s5621_s16 }
 0x16b   : > { %p5015_p7 = pnand %p5014_p8, %p5013_p5 }
 0x16c   : > { %p5020_p3 = por %p5019_p1, %p5018_p4 }
 0x16d   : > { %p5016_p9 = pneg %p5015_p7 }
 0x16e   : > { %p5022_p11 = por %p5021_p10, %p5020_p3 }
 0x170   : > { %p5023_p12 = pnand %p5022_p11, %p5016_p9 }
 0x172   : > { %5026 = shalt.err (!%p5023_p12)
}
 0x173   : > { %s5027_s20 = scalar_lea.vmem %s5624_s26, 128  ;;  %s5186_s30 = smov [#allocation2]  }
 0x174   : > { %p5028_p5 = scmp.ne.s32.totalorder %s5624_s26, %s5027_s20  ;;  %s5032_s1 = sshll.u32 %s5186_s30, 4  ;;  %s5033_s1 = int_to_ptr.vmem [resolvable:$false] %s5032_s1 }
 0x175   : > { %s5034_s11 = scalar_lea.vmem %s5033_s1, 256  ;;  %p5035_p13 = scmp.lt.s32.totalorder %s5624_s26, %s5033_s1 }
 0x176   : > { %p5030_p7 = pnand %p5028_p5, %p5014_p8  ;;  %p5036_p4 = scmp.lt.s32.totalorder %s5034_s11, %s5027_s20 }
 0x178   : > { %p5031_p0 = pneg %p5030_p7  ;;  %p5037_p1 = por %p5036_p4, %p5035_p13 }
 0x17a   : > { %p5038_p3 = pnand %p5037_p1, %p5031_p0 }
 0x17c   : > { %5041 = shalt.err (!%p5038_p3)
}
 0x17d   : > { %4555 = dma.hbm_to_vmem [thread:$0]  (!%p5628_p2), %s5621_s16, 128, %s5624_s26, %s674_s8  }
 0x17e   : > { %s695_s9 = scalar_lea.vmem [#allocation5], %s5615_s29  ;;  %s692_s28 = scalar_lea.sflag [#allocation6], %s691_s5 }
 0x17f   : > { %s702_s10 = sshll.u32 %s695_s9, 4  ;;  %s5042_s27 = scalar_lea.hbm %s5635_s2, 128  ;;  %s703_s10 = int_to_ptr.vmem [resolvable:$true] %s702_s10 }
 0x180   : > { %p5043_p13 = scmp.ne.s32.totalorder %s5635_s2, %s5042_s27  ;;  %s5047_s30 = scalar_lea.hbm %s6110_s7, 256 }
 0x181   : > { %p5048_p10 = scmp.lt.u32.totalorder %s5635_s2, %s6110_s7  ;;  %p5049_p11 = scmp.lt.u32.totalorder %s5047_s30, %s5042_s27 }
 0x182   : > { %p5045_p0 = pnand %p5043_p13, %p5014_p8  ;;  %p5051_p5 = scmp.lt.u32.totalorder %s5042_s27, %s5635_s2 }
 0x183   : > { %p5050_p12 = por %p5049_p11, %p5048_p10 }
 0x184   : > { %p5046_p9 = pneg %p5045_p0 }
 0x185   : > { %p5052_p7 = por %p5051_p5, %p5050_p12 }
 0x187   : > { %p5053_p4 = pnand %p5052_p7, %p5046_p9 }
 0x189   : > { %5056 = shalt.err (!%p5053_p4)
}
 0x18a   : > { %s5057_s8 = scalar_lea.vmem %s703_s10, 128  ;;  %s5187_s29 = smov [#allocation5]  }
 0x18b   : > { %p5058_p1 = scmp.ne.s32.totalorder %s703_s10, %s5057_s8  ;;  %s5062_s16 = sshll.u32 %s5187_s29, 4  ;;  %s5063_s16 = int_to_ptr.vmem [resolvable:$false] %s5062_s16 }
 0x18c   : > { %s5064_s26 = scalar_lea.vmem %s5063_s16, 256  ;;  %p5065_p0 = scmp.lt.s32.totalorder %s703_s10, %s5063_s16 }
 0x18d   : > { %p5060_p3 = pnand %p5058_p1, %p5014_p8  ;;  %p5066_p6 = scmp.lt.s32.totalorder %s5064_s26, %s5057_s8 }
 0x18f   : > { %p5061_p13 = pneg %p5060_p3  ;;  %p5067_p10 = por %p5066_p6, %p5065_p0 }
 0x191   : > { %p5068_p11 = pnand %p5067_p10, %p5061_p13 }
 0x193   : > { %5071 = shalt.err (!%p5068_p11)
}
 0x194   : > { %4558 = dma.hbm_to_vmem [thread:$0]  (!%p5628_p2), %s5635_s2, 128, %s703_s10, %s692_s28  }
 0x195   : > { %s6111_s5 = sld [smem:[#allocation38_spill]] }
 0x19b   : > { %p6112_p9 = scmp.ne.s32.totalorder %s6111_s5, 0 }
 0x19c   : > { %s5688_s9 = sand.u32 (!%p6112_p9), 1, %s5162_s22   ;;  %p6113_p6 = scmp.ne.s32.totalorder (!%p6112_p9), %s6105_s25, 0 }
 0x19d   : > { %711 = sbr.rel (%p6112_p9) target bundleno = 4461 (0x116d), region = 100  ;;  %s5691_s27 = sshll.u32 (!%p6112_p9), %s5688_s9, 3 }
 0x19e   : > { %s714_s0 = scalar_lea.sflag (!%p6112_p9), [#allocation3], %s5688_s9  ;;  %s717_s20 = scalar_lea.vmem (!%p6112_p9), [#allocation2], %s5691_s27 }
 0x1a4   : > { %5117 = dma.done.wait (%p6113_p6), %s714_s0, 128  }
 0x1a5   : > { %5119 = vsyncadd (%p6113_p6), %s714_s0, 4294967168  ;;  %s6114_s21 = sld [smem:[#allocation37_spill]]  ;;  %s726_s28 = scalar_lea.vmem [#allocation5], %s5691_s27 }
 0x1ab   : > { %s722_s2 = sand.u32 1, %s6114_s21  }
 0x1ac   : > { %s723_s10 = scalar_lea.sflag [#allocation6], %s722_s2 }
 0x1ad   : > { %5121 = dma.done.wait (%p6113_p6), %s723_s10, 128  }
 0x1ae   : > { %5123 = vsyncadd (%p6113_p6), %s723_s10, 4294967168  ;;  %p6115_p2 = scmp.eq.s32.totalorder %s6114_s21, 0 }
 0x1b0   : > { %5125 = dma.done.wait (%p6115_p2), [#allocation6], 128   ;;  %p6116_p8 = pmov %p6115_p2 }
 0x1b1   : > { %p6117_p12 = pmov %p6115_p2 }
 0x1b2   : > { %5127 = vsyncadd (%p6116_p8), [#allocation6], 4294967168 }
 0x1b3   : > { %5129 = dma.done.wait (%p6117_p12), [#allocation9], 528   ;;  %p6118_p5 = pmov %p6115_p2 }
 0x1b4   : > { %p6119_p7 = pmov %p6115_p2 }
 0x1b5   : > { %5131 = vsyncadd (%p6118_p5), [#allocation9], 4294966768 }
 0x1b6   : > { %5133 = dma.done.wait (%p6119_p7), [#allocation12], 528   ;;  %p6120_p4 = pmov %p6115_p2 }
 0x1b7   : > { %p6121_p1 = pmov %p6115_p2 }
 0x1b8   : > { %5135 = vsyncadd (%p6120_p4), [#allocation12], 4294966768 }
 0x1b9   : > { %5137 = dma.done.wait (%p6121_p1), [#allocation15], 32   ;;  %p6122_p3 = pmov %p6121_p1 }
 0x1ba   : > { %p6123_p13 = pmov %p6121_p1 }
 0x1bb   : > { %5139 = vsyncadd (%p6122_p3), [#allocation15], 4294967264 }
 0x1bc   : > { %5141 = dma.done.wait (%p6123_p13), [#allocation18], 32   ;;  %p6124_p0 = pmov %p6121_p1 }
 0x1be   : > { %5143 = vsyncadd (%p6124_p0), [#allocation18], 4294967264  ;;  %p6125_p10 = pmov %p6124_p0 }
 0x1bf   : > { %p6126_p11 = pmov %p6124_p0 }
 0x1c0   : > { %5145 = dma.done.wait (%p6125_p10), [#allocation21], 32  }
 0x1c1   : > { %5147 = vsyncadd (%p6126_p11), [#allocation21], 4294967264  ;;  %p6127_p9 = pmov %p6124_p0 }
 0x1c2   : > { %p6128_p6 = pmov %p6124_p0 }
 0x1c3   : > { %5149 = dma.done.wait (%p6127_p9), [#allocation24], 16  }
 0x1c4   : > { %5151 = vsyncadd (%p6128_p6), [#allocation24], 4294967280  ;;  %vm843_vm0 = vcmask 261120   ;;  %v836_v0 = vld [vmem:[%s717_s20] sm:$0xff]  ;;  %s6129_s1 = sld [smem:[#allocation42_spill]]  ;;  %v5188_v10 = vmov 0.0|0.0  }
 0x1c5   : > { %v844_v1 = vsel %vm843_vm0, %v836_v0, 0.0  ;;  %4425 = vmatprep.subr.bf16.mxu0 %v5188_v10  ;;  %vm5189_vm1 = vmmov 0   ;;  %v5190_v13 = vmov 0.0   ;;  %v4114_v19 = vld [vmem:[#allocation14] ss:$0 sm:$0xff]  ;;  %vm1374_vm2 = vcmask 64512  }
 0x1c6   : > { %845 = vadd.xlane.f32.xlu0 %v844_v1  ;;  %4250 = vmatprep.mubr.msk.f32.mxu0 %vm5189_vm1, %v5190_v13  ;;  %v4115_v21 = vld [vmem:[#allocation16] ss:$0 sm:$0xff]  ;;  %v838_v50 = vld [vmem:[#allocation7] sm:$0xff]  ;;  %s6131_s10 = sld [smem:[#allocation43_spill]]  ;;  %s6132_s0 = sld [smem:[#allocation45_spill]]  ;;  %vm3782_vm4 = vcmask 523264  }
 0x1c7   : > { %4258 = vmatprep.subr.mxu1 %v5190_v13  ;;  %4260 = vmatprep.mubr.msk.f32.mxu1 %vm5189_vm1, %v5190_v13  ;;  %vm839_vm3 = vcmp.eq.f32.partialorder %v838_v50, 0.0  ;;  %s6133_s16 = sld [smem:[#allocation51_spill]]  ;;  %s6135_s25 = sld [smem:[#allocation53_spill]] }
 0x1c8   : > { %v840_v51 = vsel %vm839_vm3, -1e+30, %v5190_v13  ;;  %s4162_s30 = sshll.u32 %s6114_s21, 7  ;;  %s6136_s26 = sld [smem:[#allocation54_spill]] }
 0x1c9   : > { %s3859_s20 = scalar_lea.sflag [#allocation4], %s5688_s9  ;;  %p6137_p8 = scmp.ne.s32.totalorder %s6106_s6, 0 }
 0x1ca   : > { %s6130_s11 = smov %s6129_s1  ;;  %v872_v7 = vld [vmem:[%s6129_s1] sm:$0xff]  ;;  %s835_s1 = scalar_lea.vmem [#allocation25], %s5691_s27 }
 0x1cb   : > { %v873_v8 = vld [vmem:[%s6130_s11 + $0x8] sm:$0xff]  ;;  %v874_v9 = vld [vmem:[%s6130_s11 + $0x10] sm:$0xff]  ;;  %v875_v12 = vld [vmem:[%s6130_s11 + $0x18] sm:$0xff]  ;;  %s3872_s8 = sshll.u32 %s835_s1, 4  ;;  %s5191_s27 = smov [#allocation25]   ;;  %s5989_s8 = int_to_ptr.vmem [resolvable:$true] %s3872_s8 }
 0x1cc   : > { %v4426_v11 = vpack.c.bf16 %v873_v8, %v872_v7  ;;  %v4429_v14 = vpack.c.bf16 %v875_v12, %v874_v9  ;;  %v1367_v50 = vld [vmem:[%s6131_s10 + $0x10] sm:$0xff]  ;;  %s5072_s2 = scalar_lea.vmem %s5989_s8, 128  ;;  %s5076_s21 = sshll.u32 %s5191_s27, 4  ;;  %s5077_s21 = int_to_ptr.vmem [resolvable:$false] %s5076_s21 }
 0x1cd   : > { %p5073_p2 = scmp.ne.s32.totalorder %s5989_s8, %s5072_s2  ;;  %p5079_p7 = scmp.lt.s32.totalorder %s5989_s8, %s5077_s21 }
 0x1ce   : > { %4427 = vmatpush3.bf16.msra.mxu0 %v4426_v11  ;;  %s5987_s5 = scalar_lea.hbm %s6136_s26, %s4162_s30 }
 0x1cf   : > { %4428 = vmatprep.subr.bf16.mxu0 %v5188_v10  ;;  %p5074_p12 = pnand %p5073_p2, %p6137_p8 }
 0x1d1   : > { %p5075_p5 = pneg %p5074_p12 }
 0x1d2   : > { %4430 = vmatpush3.bf16.msra.mxu0 %v4429_v14 }
 0x1d3   : > { %4253 = vmatprep.subr.mxu0 %v5190_v13 }
 0x253   : > { %v846_v2 = vpop.xlane.xlu0 %845 }
 0x254   : > { %v848_v3 = vmul.f32 0.03125, %v846_v2 }
 0x256   : > { %v849_v4 = vsub.f32 %v836_v0, %v848_v3 }
 0x258   : > { %v850_v5 = vmul.f32 %v849_v4, %v849_v4 }
 0x25a   : > { %v851_v6 = vsel %vm843_vm0, %v850_v5, 0.0 }
 0x25b   : > { %852 = vadd.xlane.f32.xlu0 %v851_v6 }
 0x2e8   : > { %v853_v15 = vpop.xlane.xlu0 %852 }
 0x2e9   : > { %v854_v16 = vmul.f32 0.03125, %v853_v15 }
 0x2eb   : > { %v855_v17 = vadd.f32 1e-05, %v854_v16 }
 0x2ed   : > { %4638 = vrsqrt.f32 %v855_v17 }
 0x2f7   : > { %v4639_v18 = vpop.eup %4638 }
 0x2f8   : > { %v857_v20 = vmul.f32 %v4639_v18, %v849_v4 }
 0x2fa   : > { %v864_v22 = vmul.f32 %v4114_v19, %v857_v20 }
 0x2fc   : > { %v5755_v23 = vadd.f32 %v4115_v21, %v864_v22 }
 0x2fe   : > { %4251 = vmatmul.mubr.msk.f32.vlgmr.msra.gmra.mrb[0].mxu0 %vm843_vm0, %v5755_v23 }
 0x2ff   : > { %4255 = vmatprep.mubr.msk.f32.mxu0 %vm5189_vm1, %v5190_v13 }
 0x3d1   : > { %v945_v24 = vpop.f32.mrb[0].mxu0 }
 0x3d2   : > { %949 = vxpose.xlu1.b32.start.end [1/1] (short) (narrow) %v945_v24, 96  ;;  %v4252_v25 = vpop.f32.mrb[1].mxu0 }
 0x452   : > { %v965_v26 = vpop.trf.xlu1 }
 0x453   : > { %981 = vxpose.xlu0.b32.start.end [1/1] (short) (narrow) %v965_v26, 8 }
 0x456   : > { %v966_v27 = vpop.trf.xlu1 }
 0x457   : > { %1013 = vxpose.xlu0.b32.start.end [1/1] (short) (narrow) %v966_v27, 8 }
 0x45a   : > { %v967_v28 = vpop.trf.xlu1 }
 0x45b   : > { %1045 = vxpose.xlu0.b32.start.end [1/1] (short) (narrow) %v967_v28, 8 }
 0x45e   : > { %v968_v29 = vpop.trf.xlu1 }
 0x45f   : > { %1077 = vxpose.xlu0.b32.start.end [1/1] (short) (narrow) %v968_v29, 8 }
 0x462   : > { %v969_v30 = vpop.trf.xlu1 }
 0x463   : > { %1109 = vxpose.xlu1.b32.start.end [1/1] (short) (narrow) %v969_v30, 8 }
 0x466   : > { %v970_v31 = vpop.trf.xlu1 }
 0x467   : > { %1141 = vxpose.xlu1.b32.start.end [1/1] (short) (narrow) %v970_v31, 8  ;;  %v1366_v31 = vld [vmem:[%s6131_s10 + $0x8] sm:$0xff] }
 0x46a   : > { %v971_v32 = vpop.trf.xlu1 }
 0x46b   : > { %1173 = vxpose.xlu1.b32.start.end [1/1] (short) (narrow) %v971_v32, 8  ;;  %v1365_v32 = vld [vmem:[%s6131_s10] sm:$0xff] }
 0x46e   : > { %v972_v33 = vpop.trf.xlu1 }
 0x46f   : > { %1205 = vxpose.xlu1.b32.start.end [1/1] (short) (narrow) %v972_v33, 8 }
 0x472   : > { %v973_v34 = vpop.trf.xlu1 }
 0x476   : > { %v974_v35 = vpop.trf.xlu1 }
 0x47a   : > { %v975_v36 = vpop.trf.xlu1 }
 0x47e   : > { %v976_v38 = vpop.trf.xlu1 }
 0x4d3   : > { %v997_v37 = vpop.trf.xlu0 }
 0x4d4   : > { %v1370_v41 = vmul.f32 0.35355338, %v997_v37 }
 0x4d7   : > { %v1029_v39 = vpop.trf.xlu0 }
 0x4d8   : > { %v1371_v44 = vmul.f32 0.35355338, %v1029_v39 }
 0x4db   : > { %v1061_v42 = vpop.trf.xlu0 }
 0x4dc   : > { %v1372_v46 = vmul.f32 0.35355338, %v1061_v42 }
 0x4df   : > { %v1093_v47 = vpop.trf.xlu0 }
 0x4e0   : > { %v1373_v49 = vmul.f32 0.35355338, %v1093_v47 }
 0x4e3   : > { %v1125_v40 = vpop.trf.xlu1 }
 0x4e4   : > { %4254 = vmatpush3.xpose.msk.msra.mxu0 %vm1374_vm2, %v1125_v40 }
 0x4e5   : > { %4263 = vmatprep.subr.mxu0 %v5190_v13 }
 0x4e7   : > { %4256 = vmatmul.mubr.msk.f32.vlgmr.msra.gmra.mrb[2].mxu0 %vm1374_vm2, %v1370_v41  ;;  %v1157_v43 = vpop.trf.xlu1  ;;  %v1368_v41 = vld [vmem:[%s6131_s10 + $0x18] sm:$0xff] }
 0x4e8   : > { %4259 = vmatpush3.xpose.msk.msra.mxu1 %vm1374_vm2, %v1157_v43  ;;  %4265 = vmatprep.mubr.msk.f32.mxu0 %vm5189_vm1, %v5190_v13 }
 0x4e9   : > { %4268 = vmatprep.subr.mxu1 %v5190_v13 }
 0x4eb   : > { %4261 = vmatmul.mubr.msk.f32.vlgmr.msra.gmra.mrb[0].mxu1 %vm1374_vm2, %v1371_v44  ;;  %v1189_v45 = vpop.trf.xlu1 }
 0x4ec   : > { %4264 = vmatpush3.xpose.msk.msra.mxu0 %vm1374_vm2, %v1189_v45  ;;  %4270 = vmatprep.mubr.msk.f32.mxu1 %vm5189_vm1, %v5190_v13 }
 0x4ed   : > { %4273 = vmatprep.subr.mxu0 %v5190_v13 }
 0x4ef   : > { %4266 = vmatmul.mubr.msk.f32.vlgmr.msra.gmra.mrb[4].mxu0 %vm1374_vm2, %v1372_v46  ;;  %v1221_v48 = vpop.trf.xlu1 }
 0x4f0   : > { %4269 = vmatpush3.xpose.msk.msra.mxu1 %vm1374_vm2, %v1221_v48  ;;  %4275 = vmatprep.mubr.msk.f32.mxu0 %vm5189_vm1, %v5190_v13 }
 0x4f1   : > { %4278 = vmatprep.subr.mxu1 %v5190_v13 }
 0x4f3   : > { %4271 = vmatmul.mubr.msk.f32.vlgmr.msra.gmra.mrb[2].mxu1 %vm1374_vm2, %v1373_v49 }
 0x4f4   : > { %4280 = vmatprep.mubr.msk.f32.mxu1 %vm5189_vm1, %v5190_v13 }
 0x5ba   : > { %v1447_v52 = vpop.f32.mrb[2].mxu0 }
 0x5bb   : > { %v1448_v53 = vadd.f32 %v1447_v52, %v840_v51  ;;  %v4257_v54 = vpop.f32.mrb[3].mxu0 }
 0x5bd   : > { %v1679_v55 = vsel %vm1374_vm2, %v1448_v53, -inf }
 0x5be   : > { %v1523_v56 = vpop.f32.mrb[0].mxu1  ;;  %1680 = vmax.xlane.f32.xlu1 %v1679_v55 }
 0x5bf   : > { %v1524_v57 = vadd.f32 %v1523_v56, %v840_v51  ;;  %v4262_v58 = vpop.f32.mrb[1].mxu1 }
 0x5c1   : > { %v1682_v59 = vsel %vm1374_vm2, %v1524_v57, -inf }
 0x5c2   : > { %1683 = vmax.xlane.f32.xlu0 %v1682_v59  ;;  %v1599_v60 = vpop.f32.mrb[4].mxu0 }
 0x5c3   : > { %v1600_v61 = vadd.f32 %v1599_v60, %v840_v51  ;;  %v4267_v62 = vpop.f32.mrb[5].mxu0 }
 0x5c5   : > { %v1685_v63 = vsel %vm1374_vm2, %v1600_v61, -inf }
 0x5c6   : > { %v1675_v0 = vpop.f32.mrb[2].mxu1  ;;  %1686 = vmax.xlane.f32.xlu1 %v1685_v63 }
 0x5c7   : > { %v1676_v1 = vadd.f32 %v1675_v0, %v840_v51  ;;  %v4272_v2 = vpop.f32.mrb[3].mxu1 }
 0x5c9   : > { %v1688_v3 = vsel %vm1374_vm2, %v1676_v1, -inf }
 0x5ca   : > { %1689 = vmax.xlane.f32.xlu1 %v1688_v3 }
 0x5ef   : > { %1269 = vxpose.xlu0.b32.start.end [1/1] (short) (narrow) %v974_v35, 8 }
 0x5f3   : > { %1301 = vxpose.xlu0.b32.start.end [1/1] (short) (narrow) %v975_v36, 8 }
 0x5f7   : > { %1333 = vxpose.xlu0.b32.start.end [1/1] (short) (narrow) %v976_v38, 8 }
 0x5fd   : > { %1237 = vxpose.xlu1.b32.start.end [1/1] (short) (narrow) %v973_v34, 8 }
 0x64b   : > { %v1681_v4 = vpop.xlane.xlu1 %1680 }
 0x64c   : > { %v1691_v5 = vsub.f32 %v1448_v53, %v1681_v4 }
 0x64e   : > { %v1695_v6 = vmul.f32 1.442695, %v1691_v5  ;;  %v4133_v5 = vld [vmem:[#allocation8] ss:$0 sm:$0xff] }
 0x64f   : > { %v1684_v7 = vpop.xlane.xlu0 %1683 }
 0x650   : > { %4640 = vpow2.f32 %v1695_v6  ;;  %v1692_v8 = vsub.f32 %v1524_v57, %v1684_v7 }
 0x652   : > { %v1697_v9 = vmul.f32 1.442695, %v1692_v8 }
 0x653   : > { %v1687_v11 = vpop.xlane.xlu1 %1686 }
 0x654   : > { %4642 = vpow2.f32 %v1697_v9  ;;  %v1693_v12 = vsub.f32 %v1600_v61, %v1687_v11 }
 0x656   : > { %v1699_v14 = vmul.f32 1.442695, %v1693_v12 }
 0x657   : > { %v1690_v15 = vpop.xlane.xlu1 %1689 }
 0x658   : > { %4644 = vpow2.f32 %v1699_v14  ;;  %v1694_v16 = vsub.f32 %v1676_v1, %v1690_v15 }
 0x65a   : > { %v4641_v17 = vpop.eup %4640  ;;  %v1701_v18 = vmul.f32 1.442695, %v1694_v16 }
 0x65b   : > { %v1703_v19 = vsel %vm1374_vm2, %v4641_v17, 0.0 }
 0x65c   : > { %4646 = vpow2.f32 %v1701_v18  ;;  %1704 = vadd.xlane.f32.xlu1 %v1703_v19  ;;  %v2352_v18 = vld [vmem:[%s6132_s0 + $0x8] sm:$0xff] }
 0x65e   : > { %v4643_v20 = vpop.eup %4642 }
 0x65f   : > { %v1706_v21 = vsel %vm1374_vm2, %v4643_v20, 0.0 }
 0x660   : > { %1707 = vadd.xlane.f32.xlu0 %v1706_v21 }
 0x662   : > { %v4645_v22 = vpop.eup %4644 }
 0x663   : > { %v1709_v24 = vsel %vm1374_vm2, %v4645_v22, 0.0 }
 0x664   : > { %1710 = vadd.xlane.f32.xlu1 %v1709_v24  ;;  %v2589_v24 = vld [vmem:[#allocation10 + $0x8] sm:$0xff] }
 0x666   : > { %v4647_v25 = vpop.eup %4646 }
 0x667   : > { %v1712_v26 = vsel %vm1374_vm2, %v4647_v25, 0.0 }
 0x668   : > { %1713 = vadd.xlane.f32.xlu1 %v1712_v26 }
 0x66f   : > { %v1285_v27 = vpop.trf.xlu0 }
 0x670   : > { %4279 = vmatpush3.msra.mxu1 %v1285_v27  ;;  %v2591_v27 = vld [vmem:[#allocation10 + $0x18] sm:$0xff] }
 0x671   : > { %4281 = vmatmul.mubr.msk.f32.vlgmr.msra.gmra.mrb[4].mxu1 %vm1374_vm2, %v4643_v20  ;;  %4288 = vmatprep.subr.mxu1 %v5190_v13  ;;  %v2354_v20 = vld [vmem:[%s6132_s0 + $0x18] sm:$0xff] }
 0x672   : > { %4290 = vmatprep.mubr.msk.f32.mxu1 %vm5189_vm1, %v5190_v13 }
 0x673   : > { %v1317_v28 = vpop.trf.xlu0 }
 0x677   : > { %v1349_v29 = vpop.trf.xlu0 }
 0x678   : > { %4289 = vmatpush3.msra.mxu1 %v1349_v29  ;;  %v837_v29 = vld [vmem:[%s726_s28] sm:$0xff]  ;;  %s6134_s28 = sld [smem:[#allocation52_spill]] }
 0x679   : > { %4291 = vmatmul.mubr.msk.f32.vlgmr.msra.gmra.mrb[6].mxu1 %vm1374_vm2, %v4647_v25  ;;  %4298 = vmatprep.subr.mxu1 %v5190_v13  ;;  %v2590_v25 = vld [vmem:[#allocation10 + $0x10] sm:$0xff] }
 0x67a   : > { %4300 = vmatprep.mubr.msk.f32.mxu1 %vm5189_vm1, %v5190_v13  ;;  %4299 = vmatpush3.msra.mxu1 %v1366_v31 }
 0x67b   : > { %4308 = vmatprep.subr.mxu1 %v5190_v13 }
 0x67d   : > { %v1253_v30 = vpop.trf.xlu1 }
 0x67e   : > { %4274 = vmatpush3.msra.mxu0 %v1253_v30 }
 0x67f   : > { %4276 = vmatmul.mubr.msk.f32.vlgmr.msra.gmra.mrb[6].mxu0 %vm1374_vm2, %v4641_v17  ;;  %4283 = vmatprep.subr.mxu0 %v5190_v13  ;;  %v2351_v17 = vld [vmem:[%s6132_s0] sm:$0xff] }
 0x680   : > { %4284 = vmatpush3.msra.mxu0 %v1317_v28  ;;  %4285 = vmatprep.mubr.msk.f32.mxu0 %vm5189_vm1, %v5190_v13  ;;  %v4432_v19 = vpack.c.bf16 %v2352_v18, %v2351_v17  ;;  %v4441_v28 = vpack.c.bf16 %v2591_v27, %v2590_v25 }
 0x681   : > { %4293 = vmatprep.subr.mxu0 %v5190_v13 }
 0x683   : > { %4286 = vmatmul.mubr.msk.f32.vlgmr.msra.gmra.mrb[8].mxu0 %vm1374_vm2, %v4645_v22  ;;  %v2588_v22 = vld [vmem:[#allocation10] sm:$0xff] }
 0x684   : > { %4295 = vmatprep.mubr.msk.f32.mxu0 %vm5189_vm1, %v5190_v13  ;;  %4294 = vmatpush3.msra.mxu0 %v1365_v32  ;;  %v4438_v26 = vpack.c.bf16 %v2589_v24, %v2588_v22 }
 0x685   : > { %4303 = vmatprep.subr.mxu0 %v5190_v13 }
 0x6e9   : > { %v1705_v33 = vpop.xlane.xlu1 %1704 }
 0x6ed   : > { %v1708_v34 = vpop.xlane.xlu0 %1707 }
 0x6ee   : > { %4648 = vrcp.f32 %v1708_v34  ;;  %v4134_v34 = vld [vmem:[#allocation17] ss:$0 sm:$0xff] }
 0x6f1   : > { %v1711_v35 = vpop.xlane.xlu1 %1710 }
 0x6f5   : > { %v1714_v36 = vpop.xlane.xlu1 %1713 }
 0x6f6   : > { %4650 = vrcp.f32 %v1714_v36  ;;  %v4135_v36 = vld [vmem:[#allocation19] ss:$0 sm:$0xff] }
 0x6f7   : > { %4652 = vrcp.f32 %v1705_v33 }
 0x6f8   : > { %v4649_v37 = vpop.eup %4648  ;;  %4654 = vrcp.f32 %v1711_v35 }
 0x700   : > { %v4651_v42 = vpop.eup %4650 }
 0x701   : > { %v4653_v46 = vpop.eup %4652 }
 0x702   : > { %v4655_v51 = vpop.eup %4654 }
 0x744   : > { %v1857_v38 = vpop.f32.mrb[4].mxu1 }
 0x745   : > { %v2012_v39 = vmul.f32 %v4649_v37, %v1857_v38  ;;  %v4282_v40 = vpop.f32.mrb[5].mxu1 }
 0x747   : > { %4301 = vmatmul.mubr.msk.f32.vlgmr.msra.gmra.mrb[8].mxu1 %vm1374_vm2, %v2012_v39 }
 0x748   : > { %4309 = vmatpush3.msra.mxu1 %v1368_v41  ;;  %4310 = vmatprep.mubr.msk.f32.mxu1 %vm5189_vm1, %v5190_v13 }
 0x749   : > { %4437 = vmatprep.subr.bf16.mxu1 %v5188_v10 }
 0x74c   : > { %v2003_v43 = vpop.f32.mrb[6].mxu1 }
 0x74d   : > { %v2014_v44 = vmul.f32 %v4651_v42, %v2003_v43  ;;  %v4292_v45 = vpop.f32.mrb[7].mxu1 }
 0x74f   : > { %4311 = vmatmul.mubr.msk.f32.vlgmr.msra.gmra.mrb[10].mxu1 %vm1374_vm2, %v2014_v44 }
 0x750   : > { %4332 = vmatprep.mubr.msk.f32.mxu1 %vm5189_vm1, %v5190_v13  ;;  %4439 = vmatpush3.bf16.msra.mxu1 %v4438_v26 }
 0x751   : > { %4440 = vmatprep.subr.bf16.mxu1 %v5188_v10 }
 0x752   : > { %v1784_v47 = vpop.f32.mrb[6].mxu0 }
 0x753   : > { %v2011_v48 = vmul.f32 %v4653_v46, %v1784_v47  ;;  %v4277_v49 = vpop.f32.mrb[7].mxu0 }
 0x754   : > { %4442 = vmatpush3.bf16.msra.mxu1 %v4441_v28 }
 0x755   : > { %4296 = vmatmul.mubr.msk.f32.vlgmr.msra.gmra.mrb[10].mxu0 %vm1374_vm2, %v2011_v48  ;;  %4340 = vmatprep.subr.mxu1 %v5190_v13 }
 0x756   : > { %v1930_v52 = vpop.f32.mrb[8].mxu0  ;;  %4304 = vmatpush3.msra.mxu0 %v1367_v50  ;;  %4305 = vmatprep.mubr.msk.f32.mxu0 %vm5189_vm1, %v5190_v13 }
 0x757   : > { %v2013_v53 = vmul.f32 %v4655_v51, %v1930_v52  ;;  %v4287_v54 = vpop.f32.mrb[9].mxu0  ;;  %4431 = vmatprep.subr.bf16.mxu0 %v5188_v10  ;;  %4333 = vmatmul.mubr.msk.f32.vlgmr.msra.gmra.mrb[12].mxu1 %vm843_vm0, %v837_v29 }
 0x758   : > { %4342 = vmatprep.mubr.msk.f32.mxu1 %vm5189_vm1, %v5190_v13 }
 0x759   : > { %4306 = vmatmul.mubr.msk.f32.vlgmr.msra.gmra.mrb[12].mxu0 %vm1374_vm2, %v2013_v53 }
 0x75a   : > { %4321 = vmatprep.mubr.msk.f32.mxu0 %vm5189_vm1, %v5190_v13  ;;  %4433 = vmatpush3.bf16.msra.mxu0 %v4432_v19 }
 0x75b   : > { %4434 = vmatprep.subr.bf16.mxu0 %v5188_v10 }
 0x81a   : > { %v2157_v55 = vpop.f32.mrb[8].mxu1 }
 0x81b   : > { %v4302_v56 = vpop.f32.mrb[9].mxu1  ;;  %v2308_v60 = vsel %vm843_vm0, %v2157_v55, 0.0 }
 0x822   : > { %v2303_v57 = vpop.f32.mrb[10].mxu1 }
 0x823   : > { %v4312_v58 = vpop.f32.mrb[11].mxu1  ;;  %v2312_v4 = vsel %vm843_vm0, %v2303_v57, 0.0 }
 0x828   : > { %v2084_v59 = vpop.f32.mrb[10].mxu0 }
 0x829   : > { %v2307_v61 = vsel %vm843_vm0, %v2084_v59, 0.0  ;;  %v4297_v62 = vpop.f32.mrb[11].mxu0 }
 0x82a   : > { %v2309_v63 = vadd.f32 %v2308_v60, %v2307_v61  ;;  %v2661_v39 = vpop.f32.mrb[12].mxu1 }
 0x82b   : > { %v4334_v40 = vpop.f32.mrb[13].mxu1 }
 0x82c   : > { %v2230_v0 = vpop.f32.mrb[12].mxu0 }
 0x82d   : > { %v2310_v1 = vsel %vm843_vm0, %v2230_v0, 0.0  ;;  %v4307_v2 = vpop.f32.mrb[13].mxu0 }
 0x82e   : > { %v2311_v3 = vadd.f32 %v2310_v1, %v2309_v63 }
 0x830   : > { %v2313_v6 = vadd.f32 %v2312_v4, %v2311_v3 }
 0x832   : > { %v2320_v7 = vadd.f32 %v4133_v5, %v2313_v6 }
 0x834   : > { %v2321_v8 = vadd.f32 %v2320_v7, %v5755_v23  ;;  %v2353_v23 = vld [vmem:[%s6132_s0 + $0x10] sm:$0xff] }
 0x835   : > { %v4435_v21 = vpack.c.bf16 %v2354_v20, %v2353_v23 }
 0x836   : > { %v2324_v9 = vsel %vm843_vm0, %v2321_v8, 0.0 }
 0x837   : > { %2325 = vadd.xlane.f32.xlu1 %v2324_v9  ;;  %4436 = vmatpush3.bf16.msra.mxu0 %v4435_v21 }
 0x838   : > { %4335 = vmatprep.subr.mxu0 %v5190_v13 }
 0x8c4   : > { %v2326_v11 = vpop.xlane.xlu1 %2325 }
 0x8c5   : > { %v2327_v12 = vmul.f32 0.03125, %v2326_v11 }
 0x8c7   : > { %v2328_v14 = vsub.f32 %v2321_v8, %v2327_v12 }
 0x8c9   : > { %v2329_v15 = vmul.f32 %v2328_v14, %v2328_v14 }
 0x8cb   : > { %v2330_v16 = vsel %vm843_vm0, %v2329_v15, 0.0 }
 0x8cc   : > { %2331 = vadd.xlane.f32.xlu0 %v2330_v16 }
 0x8f9   : > { %2665 = vxpose.xlu0.b32.start.end [1/1] (short) (narrow) %v2661_v39, 64 }
 0x959   : > { %v2332_v30 = vpop.xlane.xlu0 %2331 }
 0x95a   : > { %v2333_v31 = vmul.f32 0.03125, %v2332_v30 }
 0x95c   : > { %v2334_v32 = vadd.f32 1e-05, %v2333_v31 }
 0x95e   : > { %4656 = vrsqrt.f32 %v2334_v32 }
 0x968   : > { %v4657_v33 = vpop.eup %4656 }
 0x969   : > { %v2336_v35 = vmul.f32 %v4657_v33, %v2328_v14  ;;  %v2697_v33 = vld [vmem:[#allocation11] sm:$0xff] }
 0x96b   : > { %v2343_v37 = vmul.f32 %v4134_v34, %v2336_v35  ;;  %v2698_v34 = vld [vmem:[#allocation11 + $0x8] sm:$0xff] }
 0x96d   : > { %v5862_v38 = vadd.f32 %v4135_v36, %v2343_v37 }
 0x96f   : > { %4322 = vmatmul.mubr.msk.f32.vlgmr.msra.gmra.mrb[14].mxu0 %vm843_vm0, %v5862_v38 }
 0x970   : > { %4337 = vmatprep.mubr.msk.f32.mxu0 %vm5189_vm1, %v5190_v13 }
 0x979   : > { %v2681_v43 = vpop.trf.xlu0 }
 0x97a   : > { %4336 = vmatpush3.msra.mxu0 %v2681_v43 }
 0x97b   : > { %4345 = vmatprep.subr.mxu0 %v5190_v13 }
 0x97d   : > { %v2682_v44 = vpop.trf.xlu0 }
 0x97e   : > { %4341 = vmatpush3.msra.mxu1 %v2682_v44  ;;  %v2699_v44 = vld [vmem:[#allocation11 + $0x10] sm:$0xff] }
 0x97f   : > { %4350 = vmatprep.subr.mxu1 %v5190_v13 }
 0x981   : > { %v2683_v49 = vpop.trf.xlu0 }
 0x985   : > { %v2684_v50 = vpop.trf.xlu0 }
 0x989   : > { %v2685_v51 = vpop.trf.xlu0 }
 0x98d   : > { %v2686_v52 = vpop.trf.xlu0 }
 0x991   : > { %v2687_v53 = vpop.trf.xlu0 }
 0x995   : > { %v5870_v54 = vpop.trf.xlu0 }
 0xa42   : > { %v2424_v41 = vpop.f32.mrb[14].mxu0 }
 0xa43   : > { %2428 = vxpose.xlu1.b32.start.end [1/1] (short) (narrow) %v2424_v41, 32  ;;  %v4323_v42 = vpop.f32.mrb[15].mxu0 }
 0xac3   : > { %v2444_v45 = vpop.trf.xlu1 }
 0xac4   : > { %2460 = vxpose.xlu0.b32.start.end [1/1] (short) (narrow) %v2444_v45, 8 }
 0xac7   : > { %v2445_v46 = vpop.trf.xlu1 }
 0xac8   : > { %2492 = vxpose.xlu0.b32.start.end [1/1] (short) (narrow) %v2445_v46, 8 }
 0xacb   : > { %v2446_v47 = vpop.trf.xlu1 }
 0xacc   : > { %2524 = vxpose.xlu1.b32.start.end [1/1] (short) (narrow) %v2446_v47, 8 }
 0xacf   : > { %v2447_v48 = vpop.trf.xlu1 }
 0xad0   : > { %2556 = vxpose.xlu1.b32.start.end [1/1] (short) (narrow) %v2447_v48, 8 }
 0xb44   : > { %v2476_v55 = vpop.trf.xlu0 }
 0xb45   : > { %v2702_v56 = vmul.f32 0.35355338, %v2476_v55 }
 0xb47   : > { %4338 = vmatmul.mubr.msk.f32.vlgmr.msra.gmra.mrb[16].mxu0 %vm1374_vm2, %v2702_v56 }
 0xb48   : > { %4346 = vmatpush3.msra.mxu0 %v2683_v49  ;;  %v2508_v57 = vpop.trf.xlu0  ;;  %4347 = vmatprep.mubr.msk.f32.mxu0 %vm5189_vm1, %v5190_v13  ;;  %v2700_v49 = vld [vmem:[#allocation11 + $0x18] sm:$0xff] }
 0xb49   : > { %v2703_v58 = vmul.f32 0.35355338, %v2508_v57  ;;  %4355 = vmatprep.subr.mxu0 %v5190_v13 }
 0xb4b   : > { %4343 = vmatmul.mubr.msk.f32.vlgmr.msra.gmra.mrb[14].mxu1 %vm1374_vm2, %v2703_v58 }
 0xb4c   : > { %4351 = vmatpush3.msra.mxu1 %v2684_v50  ;;  %v2540_v59 = vpop.trf.xlu1  ;;  %4352 = vmatprep.mubr.msk.f32.mxu1 %vm5189_vm1, %v5190_v13 }
 0xb4d   : > { %v2704_v60 = vmul.f32 0.35355338, %v2540_v59  ;;  %4360 = vmatprep.subr.mxu1 %v5190_v13 }
 0xb4f   : > { %4348 = vmatmul.mubr.msk.f32.vlgmr.msra.gmra.mrb[18].mxu0 %vm1374_vm2, %v2704_v60 }
 0xb50   : > { %4356 = vmatpush3.xpose.msk.msra.mxu0 %vm1374_vm2, %v2685_v51  ;;  %v2572_v61 = vpop.trf.xlu1  ;;  %4357 = vmatprep.mubr.msk.f32.mxu0 %vm5189_vm1, %v5190_v13 }
 0xb51   : > { %v2705_v62 = vmul.f32 0.35355338, %v2572_v61  ;;  %4365 = vmatprep.subr.mxu0 %v5190_v13 }
 0xb53   : > { %4353 = vmatmul.mubr.msk.f32.vlgmr.msra.gmra.mrb[16].mxu1 %vm1374_vm2, %v2705_v62 }
 0xb54   : > { %4361 = vmatpush3.xpose.msk.msra.mxu1 %vm1374_vm2, %v2686_v52  ;;  %4362 = vmatprep.mubr.msk.f32.mxu1 %vm5189_vm1, %v5190_v13 }
 0xb55   : > { %4370 = vmatprep.subr.mxu1 %v5190_v13 }
 0xc1a   : > { %v2775_v63 = vpop.f32.mrb[16].mxu0 }
 0xc1b   : > { %v2998_v0 = vsel %vm1374_vm2, %v2775_v63, -inf  ;;  %v4339_v1 = vpop.f32.mrb[17].mxu0 }
 0xc1c   : > { %2999 = vmax.xlane.f32.xlu1 %v2998_v0 }
 0xc1e   : > { %v2848_v2 = vpop.f32.mrb[14].mxu1 }
 0xc1f   : > { %v3001_v3 = vsel %vm1374_vm2, %v2848_v2, -inf  ;;  %v4344_v4 = vpop.f32.mrb[15].mxu1 }
 0xc20   : > { %3002 = vmax.xlane.f32.xlu0 %v3001_v3 }
 0xc22   : > { %v2921_v5 = vpop.f32.mrb[18].mxu0 }
 0xc23   : > { %v3004_v6 = vsel %vm1374_vm2, %v2921_v5, -inf  ;;  %v4349_v7 = vpop.f32.mrb[19].mxu0 }
 0xc24   : > { %3005 = vmax.xlane.f32.xlu1 %v3004_v6  ;;  %v4154_v6 = vld [vmem:[#allocation13] ss:$0 sm:$0xff] }
 0xc26   : > { %v2994_v8 = vpop.f32.mrb[16].mxu1 }
 0xc27   : > { %v3007_v9 = vsel %vm1374_vm2, %v2994_v8, -inf  ;;  %v4354_v11 = vpop.f32.mrb[17].mxu1 }
 0xc28   : > { %3008 = vmax.xlane.f32.xlu1 %v3007_v9 }
 0xca9   : > { %v3000_v12 = vpop.xlane.xlu1 %2999 }
 0xcaa   : > { %v3010_v14 = vsub.f32 %v2775_v63, %v3000_v12 }
 0xcac   : > { %v3014_v15 = vmul.f32 1.442695, %v3010_v14 }
 0xcad   : > { %v3003_v16 = vpop.xlane.xlu0 %3002 }
 0xcae   : > { %4658 = vpow2.f32 %v3014_v15  ;;  %v3011_v17 = vsub.f32 %v2848_v2, %v3003_v16 }
 0xcb0   : > { %v3016_v18 = vmul.f32 1.442695, %v3011_v17 }
 0xcb1   : > { %v3006_v19 = vpop.xlane.xlu1 %3005 }
 0xcb2   : > { %4660 = vpow2.f32 %v3016_v18  ;;  %v3012_v23 = vsub.f32 %v2921_v5, %v3006_v19  ;;  %v3682_v19 = vld [vmem:[%s6133_s16] sm:$0xff] }
 0xcb4   : > { %v3018_v20 = vmul.f32 1.442695, %v3012_v23  ;;  %v3683_v23 = vld [vmem:[%s6133_s16 + $0x8] sm:$0xff] }
 0xcb5   : > { %v3009_v21 = vpop.xlane.xlu1 %3008 }
 0xcb6   : > { %4662 = vpow2.f32 %v3018_v20  ;;  %v3013_v22 = vsub.f32 %v2994_v8, %v3009_v21  ;;  %v4444_v20 = vpack.c.bf16 %v3683_v23, %v3682_v19  ;;  %v3685_v21 = vld [vmem:[%s6133_s16 + $0x18] sm:$0xff] }
 0xcb8   : > { %v4659_v24 = vpop.eup %4658  ;;  %v3020_v25 = vmul.f32 1.442695, %v3013_v22 }
 0xcb9   : > { %4358 = vmatmul.mubr.msk.f32.vlgmr.msra.gmra.mrb[20].mxu0 %vm1374_vm2, %v4659_v24  ;;  %v3022_v26 = vsel %vm1374_vm2, %v4659_v24, 0.0  ;;  %v3767_v24 = vld [vmem:[%s6134_s28] sm:$0xff] }
 0xcba   : > { %4664 = vpow2.f32 %v3020_v25  ;;  %4366 = vmatpush3.xpose.msk.msra.mxu0 %vm1374_vm2, %v2687_v53  ;;  %3023 = vadd.xlane.f32.xlu1 %v3022_v26  ;;  %v3768_v25 = vld [vmem:[%s6134_s28 + $0x8] sm:$0xff]  ;;  %v3769_v26 = vld [vmem:[%s6134_s28 + $0x10] sm:$0xff] }
 0xcbb   : > { %4367 = vmatprep.mubr.msk.f32.mxu0 %vm5189_vm1, %v5190_v13  ;;  %4375 = vmatprep.subr.mxu0 %v5190_v13 }
 0xcbc   : > { %v4661_v27 = vpop.eup %4660 }
 0xcbd   : > { %4363 = vmatmul.mubr.msk.f32.vlgmr.msra.gmra.mrb[18].mxu1 %vm1374_vm2, %v4661_v27  ;;  %v3025_v28 = vsel %vm1374_vm2, %v4661_v27, 0.0  ;;  %v4450_v27 = vpack.c.bf16 %v3768_v25, %v3767_v24 }
 0xcbe   : > { %4371 = vmatpush3.xpose.msk.msra.mxu1 %vm1374_vm2, %v5870_v54  ;;  %3026 = vadd.xlane.f32.xlu1 %v3025_v28  ;;  %v3770_v28 = vld [vmem:[%s6134_s28 + $0x18] sm:$0xff] }
 0xcbf   : > { %4372 = vmatprep.mubr.msk.f32.mxu1 %vm5189_vm1, %v5190_v13  ;;  %4380 = vmatprep.subr.mxu1 %v5190_v13 }
 0xcc0   : > { %v4663_v29 = vpop.eup %4662 }
 0xcc1   : > { %4368 = vmatmul.mubr.msk.f32.vlgmr.msra.gmra.mrb[22].mxu0 %vm1374_vm2, %v4663_v29  ;;  %v3028_v30 = vsel %vm1374_vm2, %v4663_v29, 0.0  ;;  %v4453_v29 = vpack.c.bf16 %v3770_v28, %v3769_v26 }
 0xcc2   : > { %3029 = vadd.xlane.f32.xlu1 %v3028_v30  ;;  %4377 = vmatprep.mubr.msk.f32.mxu0 %vm5189_vm1, %v5190_v13  ;;  %v3771_v30 = vld [vmem:[%s6134_s28 + $0x20] sm:$0xff] }
 0xcc3   : > { %4376 = vmatpush3.msra.mxu0 %v2697_v33 }
 0xcc4   : > { %v4665_v31 = vpop.eup %4664  ;;  %4385 = vmatprep.subr.mxu0 %v5190_v13 }
 0xcc5   : > { %4373 = vmatmul.mubr.msk.f32.vlgmr.msra.gmra.mrb[20].mxu1 %vm1374_vm2, %v4665_v31  ;;  %v3031_v32 = vsel %vm1374_vm2, %v4665_v31, 0.0  ;;  %v3772_v31 = vld [vmem:[%s6134_s28 + $0x28] sm:$0xff] }
 0xcc6   : > { %3032 = vadd.xlane.f32.xlu0 %v3031_v32  ;;  %4382 = vmatprep.mubr.msk.f32.mxu1 %vm5189_vm1, %v5190_v13  ;;  %v4456_v32 = vpack.c.bf16 %v3772_v31, %v3771_v30 }
 0xcc7   : > { %4381 = vmatpush3.msra.mxu1 %v2698_v34 }
 0xcc8   : > { %4390 = vmatprep.subr.mxu1 %v5190_v13 }
 0xd47   : > { %v3024_v35 = vpop.xlane.xlu1 %3023 }
 0xd48   : > { %4666 = vrcp.f32 %v3024_v35 }
 0xd4b   : > { %v3027_v36 = vpop.xlane.xlu1 %3026 }
 0xd4c   : > { %4668 = vrcp.f32 %v3027_v36 }
 0xd4f   : > { %v3030_v37 = vpop.xlane.xlu1 %3029 }
 0xd50   : > { %4670 = vrcp.f32 %v3030_v37  ;;  %v4155_v37 = vld [vmem:[#allocation20] ss:$0 sm:$0xff] }
 0xd52   : > { %v4667_v40 = vpop.eup %4666 }
 0xd53   : > { %v3033_v39 = vpop.xlane.xlu0 %3032 }
 0xd54   : > { %4672 = vrcp.f32 %v3033_v39 }
 0xd56   : > { %v4669_v45 = vpop.eup %4668 }
 0xd5a   : > { %v4671_v50 = vpop.eup %4670 }
 0xd5e   : > { %v4673_v54 = vpop.eup %4672 }
 0xd8c   : > { %v3106_v41 = vpop.f32.mrb[20].mxu0 }
 0xd8d   : > { %v3342_v42 = vmul.f32 %v4667_v40, %v3106_v41  ;;  %v4359_v43 = vpop.f32.mrb[21].mxu0  ;;  %v4156_v40 = vld [vmem:[#allocation22] ss:$0 sm:$0xff] }
 0xd8e   : > { %v3773_v43 = vld [vmem:[%s6134_s28 + $0x30] sm:$0xff] }
 0xd8f   : > { %4378 = vmatmul.mubr.msk.f32.vlgmr.msra.gmra.mrb[24].mxu0 %vm1374_vm2, %v3342_v42 }
 0xd90   : > { %v3182_v46 = vpop.f32.mrb[18].mxu1  ;;  %4386 = vmatpush3.msra.mxu0 %v2699_v44  ;;  %4387 = vmatprep.mubr.msk.f32.mxu0 %vm5189_vm1, %v5190_v13 }
 0xd91   : > { %v3343_v47 = vmul.f32 %v4669_v45, %v3182_v46  ;;  %v4364_v48 = vpop.f32.mrb[19].mxu1  ;;  %4443 = vmatprep.subr.bf16.mxu0 %v5188_v10  ;;  %v4157_v45 = vld [vmem:[#allocation23] ss:$0 sm:$0xff] }
 0xd93   : > { %4383 = vmatmul.mubr.msk.f32.vlgmr.msra.gmra.mrb[22].mxu1 %vm1374_vm2, %v3343_v47 }
 0xd94   : > { %v3258_v51 = vpop.f32.mrb[22].mxu0  ;;  %4391 = vmatpush3.msra.mxu1 %v2700_v49  ;;  %4392 = vmatprep.mubr.msk.f32.mxu1 %vm5189_vm1, %v5190_v13 }
 0xd95   : > { %v3344_v52 = vmul.f32 %v4671_v50, %v3258_v51  ;;  %v4369_v53 = vpop.f32.mrb[23].mxu0  ;;  %4449 = vmatprep.subr.bf16.mxu1 %v5188_v10  ;;  %v4159_v50 = vld [vmem:[%s6135_s25] ss:$0 sm:$0xff]  ;;  %s5078_s25 = scalar_lea.vmem %s5077_s21, 256 }
 0xd96   : > { %p5080_p4 = scmp.lt.s32.totalorder %s5078_s25, %s5072_s2 }
 0xd97   : > { %4388 = vmatmul.mubr.msk.f32.vlgmr.msra.gmra.mrb[26].mxu0 %vm1374_vm2, %v3344_v52 }
 0xd98   : > { %v3334_v55 = vpop.f32.mrb[20].mxu1  ;;  %4403 = vmatprep.mubr.msk.f32.mxu0 %vm5189_vm1, %v5190_v13  ;;  %4445 = vmatpush3.bf16.msra.mxu0 %v4444_v20  ;;  %p5081_p1 = por %p5080_p4, %p5079_p7 }
 0xd99   : > { %v3345_v56 = vmul.f32 %v4673_v54, %v3334_v55  ;;  %v4374_v57 = vpop.f32.mrb[21].mxu1  ;;  %4446 = vmatprep.subr.bf16.mxu0 %v5188_v10 }
 0xd9a   : > { %p5082_p3 = pnand %p5081_p1, %p5075_p5 }
 0xd9b   : > { %4393 = vmatmul.mubr.msk.f32.vlgmr.msra.gmra.mrb[24].mxu1 %vm1374_vm2, %v3345_v56 }
 0xd9c   : > { %4422 = vmatprep.mubr.msk.f32.mxu1 %vm5189_vm1, %v5190_v13  ;;  %4451 = vmatpush3.bf16.msra.mxu1 %v4450_v27 }
 0xd9d   : > { %4452 = vmatprep.subr.bf16.mxu1 %v5188_v10 }
 0xda0   : > { %4454 = vmatpush3.bf16.msra.mxu1 %v4453_v29 }
 0xda1   : > { %4455 = vmatprep.subr.bf16.mxu1 %v5188_v10 }
 0xda4   : > { %4457 = vmatpush3.bf16.msra.mxu1 %v4456_v32 }
 0xda5   : > { %4458 = vmatprep.subr.bf16.mxu1 %v5188_v10  ;;  %v3774_v10 = vld [vmem:[%s6134_s28 + $0x38] sm:$0xff] }
 0xda6   : > { %v4459_v44 = vpack.c.bf16 %v3774_v10, %v3773_v43 }
 0xda8   : > { %4460 = vmatpush3.bf16.msra.mxu1 %v4459_v44 }
 0xe62   : > { %v3415_v58 = vpop.f32.mrb[24].mxu0 }
 0xe63   : > { %v4379_v59 = vpop.f32.mrb[25].mxu0  ;;  %v3638_v61 = vsel %vm843_vm0, %v3415_v58, 0.0 }
 0xe66   : > { %v3488_v60 = vpop.f32.mrb[22].mxu1 }
 0xe67   : > { %v3639_v62 = vsel %vm843_vm0, %v3488_v60, 0.0  ;;  %v4384_v63 = vpop.f32.mrb[23].mxu1 }
 0xe68   : > { %v3640_v0 = vadd.f32 %v3639_v62, %v3638_v61 }
 0xe6a   : > { %v3561_v1 = vpop.f32.mrb[26].mxu0 }
 0xe6b   : > { %v3641_v2 = vsel %vm843_vm0, %v3561_v1, 0.0  ;;  %v4389_v3 = vpop.f32.mrb[27].mxu0 }
 0xe6c   : > { %v3642_v4 = vadd.f32 %v3641_v2, %v3640_v0 }
 0xe6e   : > { %v3634_v5 = vpop.f32.mrb[24].mxu1 }
 0xe6f   : > { %v3643_v7 = vsel %vm843_vm0, %v3634_v5, 0.0  ;;  %v4394_v8 = vpop.f32.mrb[25].mxu1 }
 0xe70   : > { %v3644_v13 = vadd.f32 %v3643_v7, %v3642_v4 }
 0xe72   : > { %v3651_v9 = vadd.f32 %v4154_v6, %v3644_v13 }
 0xe74   : > { %v3652_v11 = vadd.f32 %v3651_v9, %v5862_v38  ;;  %v3684_v38 = vld [vmem:[%s6133_s16 + $0x10] sm:$0xff] }
 0xe75   : > { %v4447_v22 = vpack.c.bf16 %v3685_v21, %v3684_v38 }
 0xe76   : > { %v3655_v12 = vsel %vm843_vm0, %v3652_v11, 0.0 }
 0xe77   : > { %3656 = vadd.xlane.f32.xlu1 %v3655_v12  ;;  %4448 = vmatpush3.bf16.msra.mxu0 %v4447_v22 }
 0xf04   : > { %v3657_v14 = vpop.xlane.xlu1 %3656 }
 0xf05   : > { %v3658_v15 = vmul.f32 0.03125, %v3657_v14 }
 0xf07   : > { %v3659_v16 = vsub.f32 %v3652_v11, %v3658_v15 }
 0xf09   : > { %v3660_v17 = vmul.f32 %v3659_v16, %v3659_v16 }
 0xf0b   : > { %v3661_v18 = vsel %vm843_vm0, %v3660_v17, 0.0 }
 0xf0c   : > { %3662 = vadd.xlane.f32.xlu0 %v3661_v18 }
 0xf99   : > { %v3663_v33 = vpop.xlane.xlu0 %3662 }
 0xf9a   : > { %v3664_v34 = vmul.f32 0.03125, %v3663_v33 }
 0xf9c   : > { %v3665_v35 = vadd.f32 1e-05, %v3664_v34 }
 0xf9e   : > { %4674 = vrsqrt.f32 %v3665_v35 }
 0xfa8   : > { %v4675_v36 = vpop.eup %4674 }
 0xfa9   : > { %v3667_v39 = vmul.f32 %v4675_v36, %v3659_v16 }
 0xfab   : > { %v3674_v41 = vmul.f32 %v4155_v37, %v3667_v39 }
 0xfad   : > { %v3681_v42 = vadd.f32 %v4156_v40, %v3674_v41 }
 0xfaf   : > { %4404 = vmatmul.mubr.msk.f32.vlgmr.msra.gmra.mrb[28].mxu0 %vm843_vm0, %v3681_v42 }
0x1082   : > { %v3762_v46 = vpop.f32.mrb[28].mxu0 }
0x1083   : > { %v3763_v47 = vadd.f32 %v4157_v45, %v3762_v46  ;;  %v4405_v48 = vpop.f32.mrb[29].mxu0 }
0x1085   : > { %v3766_v49 = vmax.f32 %v3763_v47, 0.0 }
0x1087   : > { %4423 = vmatmul.mubr.msk.f32.vlgmr.msra.gmra.mrb[26].mxu1 %vm3782_vm4, %v3766_v49 }
0x115a   : > { %v3852_v51 = vpop.f32.mrb[26].mxu1 }
0x115b   : > { %v3853_v52 = vadd.f32 %v4159_v50, %v3852_v51  ;;  %v4424_v53 = vpop.f32.mrb[27].mxu1 }
0x115d   : > { %v3856_v54 = vadd.f32 %v3853_v52, %v3652_v11 }
0x115f   : > { %3857 = vst.msk [vmem:[%s835_s1] sm:$0xff] %vm843_vm0, %v3856_v54 }
0x1160   : > { %5085 = shalt.err (!%p5082_p3)
}
0x1161   : > { %s5086_s9 = scalar_lea.hbm %s5987_s5, 128  ;;  %s5090_s0 = scalar_lea.hbm %s6136_s26, 256 }
0x1162   : > { %p5087_p13 = scmp.ne.s32.totalorder %s5987_s5, %s5086_s9  ;;  %p5091_p11 = scmp.lt.u32.totalorder %s5987_s5, %s6136_s26 }
0x1163   : > { %p5092_p9 = scmp.lt.u32.totalorder %s5090_s0, %s5086_s9  ;;  %p5094_p2 = scmp.lt.u32.totalorder %s5086_s9, %s5987_s5 }
0x1164   : > { %p5088_p0 = pnand %p5087_p13, %p6137_p8 }
0x1165   : > { %p5093_p6 = por %p5092_p9, %p5091_p11 }
0x1166   : > { %p5089_p10 = pneg %p5088_p0 }
0x1167   : > { %p5095_p12 = por %p5094_p2, %p5093_p6 }
0x1169   : > { %p5096_p5 = pnand %p5095_p12, %p5089_p10 }
0x116b   : > { %5099 = shalt.err (!%p5096_p5)
}
0x116c   : > { %4513 = dma.vmem_to_hbm [thread:$0]  (%p6137_p8), %s5989_s8, 128, %s5987_s5, %s3859_s20  }
0x116d PF: > { %s6138_s2 = sld [smem:[#allocation36_spill]]  ;;  %p6139_p7 = scmp.ne.s32.totalorder %s6107_s3, 0 }
0x116e   : > { %p6140_p4 = scmp.ge.s32.totalorder %s5170_s24, 2 }
0x1170   : > { %p4560_p1 = pnand %p6140_p4, %p6139_p7 }
0x1173   : > { %s3884_s21 = sand.u32 1, %s6138_s2  }
0x1174   : > { %s3885_s25 = scalar_lea.sflag [#allocation4], %s3884_s21 }
0x1175   : > { %5153 = dma.done.wait (!%p4560_p1), %s3885_s25, 128  }
0x1176   : > { %5155 = vsyncadd (!%p4560_p1), %s3885_s25, 4294967168  ;;  %p42_p3 = scmp.ge.s32.totalorder %s5581_s4, 4   ;;  %s6141_s1 = smov %s5162_s22 }
0x1177   : > { %s6142_s22 = smov %s5166_s23  ;;  %s6143_s23 = smov %s5592_s18 }
0x1178   : > { %s6144_s24 = smov %s5581_s4  ;;  %44 = sbr.rel (!%p42_p3) target bundleno = 30 (0x1e), region = 206 }
0x117f   :  { %3890 = vsyncpa [#allocation3], 1 }
0x1180   :  { %3892 = vsyncpa [#allocation3 + $0x1], 1 }
0x1181   :  { %3893 = vsyncpa [#allocation6], 1 }
0x1182   :  { %3895 = vsyncpa [#allocation6 + $0x1], 1 }
0x1183   :  { %3896 = vsyncpa [#allocation9], 1 }
0x1184   :  { %3897 = vsyncpa [#allocation12], 1 }
0x1185   :  { %3898 = vsyncpa [#allocation15], 1 }
0x1186   :  { %3899 = vsyncpa [#allocation18], 1 }
0x1187   :  { %3900 = vsyncpa [#allocation21], 1 }
0x1188   :  { %3901 = vsyncpa [#allocation24], 1 }
0x1189   :  { %3902 = vsyncpa [#allocation4], 1 }
0x118a   :  { %3904 = vsyncpa [#allocation4 + $0x1], 1 }

</bundles_post_ra>
